<compile_context>
chip_gen: v6e
topology: v6e:2x2x1
jax: 0.10.0
libtpu: 0.0.40
codegen_flags: <defaults>
</compile_context>

<pallas_src>
import numpy as np
import jax
import jax.numpy as jnp
from jax.experimental import pallas as pl
from jax.experimental.pallas import tpu as pltpu

SELU_ALPHA = 1.6732632423543772
SELU_SCALE = 1.0507009873554805


def _selu(v):
    # exp() only sees the non-positive branch (avoids inf in the unselected branch).
    return SELU_SCALE * jnp.where(
        v > 0, v, SELU_ALPHA * (jnp.exp(jnp.minimum(v, 0.0)) - 1.0))


def _choose_batching(N, Cmax, target_rows=64):
    """Images per grid step (Nb) and number of grid steps (Ng)."""
    nb = max(1, min(N, target_rows // max(1, Cmax)))   # fill ~8 sublane groups
    # keep >= 2 grid steps when possible so a v7x megacore can shard the batch
    if N > 1 and -(-N // nb) < 2:
        nb = max(1, -(-N // 2))
    ng = -(-N // nb)
    return nb, ng


# ------------------------- fused kernel -------------------------

def _make_fused_kernel(*, n_mid, k, W, HW, PAD, L, NbCmax, with_sel):
    p = k // 2
    n_w = 5 + 2 * n_mid   # planes_in, wblk_in, (planes_m, wblk_m)*n_mid, planes_out, wblk_out, wblk_short

    def kernel(*refs):
        x_ref = refs[0]
        wrefs = refs[1:1 + n_w]
        pos = 1 + n_w
        sel_ref = None
        if with_sel:
            sel_ref = refs[pos]
            pos += 1
        o_ref = refs[pos]
        pad_ref = refs[pos + 1]          # VMEM scratch (Nb*Cmax, L), lane-aligned halos

        # Zero ONLY the halo columns; every depthwise fully rewrites the centre
        # rows it reads, and nothing ever writes the halo, so this is sufficient.
        pad_ref[:, 0:PAD] = jnp.zeros((NbCmax, PAD), jnp.float32)
        pad_ref[:, PAD + HW:L] = jnp.zeros((NbCmax, L - PAD - HW), jnp.float32)

        def depthwise(h, plane_ref):
            """'same' kxk depthwise conv, stride 1 (per row = per channel per image).
            h: (rows, HW);  plane_ref: (k*k, rows, HW) precomputed weight*colmask planes."""
            rows = h.shape[0]
            pad_ref[0:rows, PAD:PAD + HW] = h          # lane-aligned centre store
            row_sums = []                              # one accumulator per tap row -> ILP
            for i in range(k):
                acc = None
                for j in range(k):
                    t = i * k + j
                    start = PAD + (i - p) * W + (j - p)
                    term = pad_ref[0:rows, start:start + HW] * plane_ref[t]
                    acc = term if acc is None else acc + term
                row_sums.append(acc)
            out = row_sums[0]
            for r in row_sums[1:]:
                out = out + r
            return out

        def pointwise(h, wblk_ref):
            """Batched 1x1 conv as a block-diagonal MXU matmul (keeps the VALU free)."""
            return jnp.dot(wblk_ref[...], h, preferred_element_type=jnp.float32)

        x = x_ref[0]                                   # (Nb*Cin, HW), lane-dense

        # inconv + SELU
        h = _selu(pointwise(depthwise(x, wrefs[0]), wrefs[1]))
        # convlayers: (num_layers - 2) x [SeparableConv2d + SELU]
        for m in range(n_mid):
            h = _selu(pointwise(depthwise(h, wrefs[2 + 2 * m]), wrefs[3 + 2 * m]))

        # out_conv (stride) + shortcut + SELU
        d = depthwise(h, wrefs[2 + 2 * n_mid])
        if with_sel:
            # subsample BEFORE the last pointwise / shortcut / SELU -> stride^2 less tail work
            d = jnp.dot(d, sel_ref[...], preferred_element_type=jnp.float32)
            xs = jnp.dot(x, sel_ref[...], preferred_element_type=jnp.float32)
        else:
            xs = x
        z = _selu(pointwise(d, wrefs[3 + 2 * n_mid]) + pointwise(xs, wrefs[4 + 2 * n_mid]))
        o_ref[0] = z

    return kernel


# ------------------------- wrapper -------------------------

def residual_block_forward(x_nchw, params, stride):
    """x_nchw: (N, Cin, H, W).  Returns (N, Cout, Ho, Wo), same semantics as PyTorch."""
    N, Cin, H, W = map(int, x_nchw.shape)
    k = int(params["dw_in"].shape[0])
    Cout = int(params["pw_in"].shape[1])
    p = k // 2
    HW = H * W
    Ho = (H + 2 * p - k) // stride + 1
    Wo = (W + 2 * p - k) // stride + 1
    HoWo = Ho * Wo
    Cmax = max(Cin, Cout)
    n_mid = len(params["mid"])

    Nb, Ng = _choose_batching(N, Cmax)

    # lane-aligned halos on the flattened spatial axis (need >= p*W + p zeros per side)
    halo = -(-(p * W + p) // 128) * 128
    PAD = halo
    L = PAD + HW + halo

    # column-validity masks per horizontal tap offset j (flattened-row wraparound)
    cols = np.arange(HW, dtype=np.int64) % W
    colmask = np.stack(
        [((cols + (j - p) >= 0) & (cols + (j - p) < W)).astype(np.float32) for j in range(k)], 0)
    mask_per_tap = jnp.asarray(colmask[np.arange(k * k) % k])        # (k*k, HW)

    def make_planes(dw):
        # dw: (k, k, C) -> per-tap (weight x column-mask) planes, tiled over Nb stacked images
        C = int(dw.shape[-1])
        w_tc = dw.reshape(k * k, C).astype(jnp.float32)              # (k*k, C)
        planes = w_tc[:, :, None] * mask_per_tap[:, None, :]         # (k*k, C, HW)
        return jnp.tile(planes, (1, Nb, 1))                          # (k*k, Nb*C, HW)

    def blkdiag(pw):
        # pw: (Cin_l, Cout_l) -> block-diagonal (Nb*Cout_l, Nb*Cin_l) for the stacked layout
        return jnp.kron(jnp.eye(Nb, dtype=jnp.float32), jnp.transpose(pw).astype(jnp.float32))

    weights = [make_planes(params["dw_in"]), blkdiag(params["pw_in"])]
    for dw, pw in params["mid"]:
        weights += [make_planes(dw), blkdiag(pw)]
    weights += [make_planes(params["dw_out"]), blkdiag(params["pw_out"]), blkdiag(params["w_short"])]

    # stack Nb images into the sublane axis (Ng, Nb*Cin, HW); pad the batch with zero images
    x_flat = x_nchw.reshape(N, Cin, HW).astype(jnp.float32)          # free row-major reshape
    if Ng * Nb != N:
        x_flat = jnp.concatenate(
            [x_flat, jnp.zeros((Ng * Nb - N, Cin, HW), jnp.float32)], axis=0)
    x_stk = x_flat.reshape(Ng, Nb * Cin, HW)

    inputs = [x_stk] + weights
    with_sel = stride > 1
    if with_sel:
        # 0/1 selection matrix implementing the stride-s spatial subsample
        g = np.arange(HoWo, dtype=np.int64)
        src = (g // Wo) * (stride * W) + (g % Wo) * stride
        sel = np.zeros((HW, HoWo), np.float32)
        sel[src, g] = 1.0
        inputs.append(jnp.asarray(sel))

    kernel = _make_fused_kernel(n_mid=n_mid, k=k, W=W, HW=HW, PAD=PAD, L=L,
                                NbCmax=Nb * Cmax, with_sel=with_sel)

    def const_spec(a):
        nd = a.ndim
        return pl.BlockSpec(tuple(a.shape), lambda n, _nd=nd: (0,) * _nd)

    in_specs = [pl.BlockSpec((1, Nb * Cin, HW), lambda n: (n, 0, 0))]
    in_specs += [const_spec(a) for a in inputs[1:]]

    out = pl.pallas_call(
        kernel,
        out_shape=jax.ShapeDtypeStruct((Ng, Nb * Cout, HoWo), jnp.float32),
        grid=(Ng,),
        in_specs=in_specs,
        out_specs=pl.BlockSpec((1, Nb * Cout, HoWo), lambda n: (n, 0, 0)),
        scratch_shapes=[pltpu.VMEM((Nb * Cmax, L), jnp.float32)],
        compiler_params=pltpu.CompilerParams(dimension_semantics=("parallel",)),
    )(*inputs)

    out = out.reshape(Ng * Nb, Cout, HoWo)[:N]       # drop batch padding (if any)
    return out.reshape(N, Cout, Ho, Wo)


# ------------------------- pure-JAX reference -------------------------

def ref_forward(x_nchw, params, stride):
    x = jnp.transpose(x_nchw, (0, 2, 3, 1)).astype(jnp.float32)

    def dwconv(v, dw, s):
        c = v.shape[-1]
        kk = dw.shape[0]
        pp = kk // 2
        w = dw.reshape(kk, kk, 1, c)
        return jax.lax.conv_general_dilated(
            v, w, (s, s), [(pp, pp), (pp, pp)],
            dimension_numbers=("NHWC", "HWIO", "NHWC"), feature_group_count=c)

    def pwconv(v, pw):
        return jnp.einsum("nhwc,co->nhwo", v, pw)

    out = _selu(pwconv(dwconv(x, params["dw_in"], 1), params["pw_in"]))
    for dw, pw in params["mid"]:
        out = _selu(pwconv(dwconv(out, dw, 1), pw))
    out = pwconv(dwconv(out, params["dw_out"], stride), params["pw_out"])
    sc = pwconv(x[:, ::stride, ::stride, :], params["w_short"])
    return jnp.transpose(_selu(out + sc), (0, 3, 1, 2))


if __name__ == "__main__":
    in_channels, out_channels, kernel_size, stride, num_layers = 4, 8, 3, 2, 3
    N, H, W = 2, 16, 16

    key = jax.random.PRNGKey(0)
    ks = jax.random.split(key, 9)
    s = 0.2  # small deterministic synthetic weights (SELU stability)
    params = {
        "dw_in": s * jax.random.normal(ks[0], (kernel_size, kernel_size, in_channels), jnp.float32),
        "pw_in": s * jax.random.normal(ks[1], (in_channels, out_channels), jnp.float32),
        "mid": [
            (s * jax.random.normal(ks[2], (kernel_size, kernel_size, out_channels), jnp.float32),
             s * jax.random.normal(ks[3], (out_channels, out_channels), jnp.float32)),
        ],  # num_layers - 2 = 1 intermediate SeparableConv2d + SELU
        "dw_out": s * jax.random.normal(ks[4], (kernel_size, kernel_size, out_channels), jnp.float32),
        "pw_out": s * jax.random.normal(ks[5], (out_channels, out_channels), jnp.float32),
        "w_short": s * jax.random.normal(ks[6], (in_channels, out_channels), jnp.float32),
    }
    x = jax.random.normal(ks[7], (N, in_channels, H, W), jnp.float32)   # NCHW input

    p = kernel_size // 2
    Ho = (H + 2 * p - kernel_size) // stride + 1

    # primary check (matches declared input shape): N=2, stride=2
    y = jax.block_until_ready(residual_block_forward(x, params, stride))
    assert y.shape == (N, out_channels, Ho, Ho), y.shape
    y_ref = ref_forward(x, params, stride)
    assert jnp.allclose(y, y_ref, atol=1e-4, rtol=1e-4), float(jnp.max(jnp.abs(y - y_ref)))

    # batched path: Nb>1 images stacked into the sublane axis, stride=2
    x8 = jax.random.normal(ks[8], (8, in_channels, H, W), jnp.float32)
    y8 = jax.block_until_ready(residual_block_forward(x8, params, stride))
    y8_ref = ref_forward(x8, params, stride)
    assert jnp.allclose(y8, y8_ref, atol=1e-4, rtol=1e-4), float(jnp.max(jnp.abs(y8 - y8_ref)))

    # stride=1 path (no in-kernel subsample matmul)
    y1 = jax.block_until_ready(residual_block_forward(x, params, 1))
    y1_ref = ref_forward(x, params, 1)
    assert jnp.allclose(y1, y1_ref, atol=1e-4, rtol=1e-4), float(jnp.max(jnp.abs(y1 - y1_ref)))

    print("KERNEL_OK")
</pallas_src>

<mosaic_0001>
module attributes {stable_mosaic.version = 11 : i64} {
  func.func @kernel(%arg0: i32, %arg1: memref<1x4x256xf32, #tpu.memory_space<vmem>>, %arg2: memref<9x4x256xf32, #tpu.memory_space<vmem>>, %arg3: memref<8x4xf32, #tpu.memory_space<vmem>>, %arg4: memref<9x8x256xf32, #tpu.memory_space<vmem>>, %arg5: memref<8x8xf32, #tpu.memory_space<vmem>>, %arg6: memref<9x8x256xf32, #tpu.memory_space<vmem>>, %arg7: memref<8x8xf32, #tpu.memory_space<vmem>>, %arg8: memref<8x4xf32, #tpu.memory_space<vmem>>, %arg9: memref<256x64xf32, #tpu.memory_space<vmem>>, %arg10: memref<1x8x64xf32, #tpu.memory_space<vmem>>, %arg11: memref<8x512xf32, #tpu.memory_space<vmem>>) attributes {dimension_semantics = [#tpu.dimension_semantics<parallel>], iteration_bounds = array<i64: 2>, scalar_prefetch = 0 : i64, scratch_operands = 1 : i64, tpu.core_type = #tpu.core_type<tc>, window_params = [{transform_indices = @transform_0, window_bounds = array<i64: 1, 4, 256>}, {pipeline_mode = #tpu.pipeline_mode<synchronous>, transform_indices = @transform_1, window_bounds = array<i64: 9, 4, 256>}, {pipeline_mode = #tpu.pipeline_mode<synchronous>, transform_indices = @transform_2, window_bounds = array<i64: 8, 4>}, {pipeline_mode = #tpu.pipeline_mode<synchronous>, transform_indices = @transform_3, window_bounds = array<i64: 9, 8, 256>}, {pipeline_mode = #tpu.pipeline_mode<synchronous>, transform_indices = @transform_4, window_bounds = array<i64: 8, 8>}, {pipeline_mode = #tpu.pipeline_mode<synchronous>, transform_indices = @transform_5, window_bounds = array<i64: 9, 8, 256>}, {pipeline_mode = #tpu.pipeline_mode<synchronous>, transform_indices = @transform_6, window_bounds = array<i64: 8, 8>}, {pipeline_mode = #tpu.pipeline_mode<synchronous>, transform_indices = @transform_7, window_bounds = array<i64: 8, 4>}, {pipeline_mode = #tpu.pipeline_mode<synchronous>, transform_indices = @transform_8, window_bounds = array<i64: 256, 64>}, {transform_indices = @transform_9, window_bounds = array<i64: 1, 8, 64>}]} {
    %cst = arith.constant 0.000000e+00 : f32
    %0 = vector.broadcast %cst : f32 to vector<8x128xf32>
    %c0 = arith.constant 0 : index
    %c0_0 = arith.constant 0 : index
    %1 = vector.load %arg11[%c0, %c0_0] : memref<8x512xf32, #tpu.memory_space<vmem>>, vector<8x128xf32>
    tpu.vector_store %arg11[%c0, %c0_0], %0 {strides = array<i32>} : memref<8x512xf32, #tpu.memory_space<vmem>>, vector<8x128xf32>,
    %cst_1 = arith.constant 0.000000e+00 : f32
    %2 = vector.broadcast %cst_1 : f32 to vector<8x128xf32>
    %c0_2 = arith.constant 0 : index
    %c384 = arith.constant 384 : index
    %3 = vector.load %arg11[%c0_2, %c384] : memref<8x512xf32, #tpu.memory_space<vmem>>, vector<8x128xf32>
    tpu.vector_store %arg11[%c0_2, %c384], %2 {strides = array<i32>} : memref<8x512xf32, #tpu.memory_space<vmem>>, vector<8x128xf32>,
    %c0_3 = arith.constant 0 : index
    %c0_4 = arith.constant 0 : index
    %c0_5 = arith.constant 0 : index
    %4 = vector.load %arg1[%c0_3, %c0_4, %c0_5] : memref<1x4x256xf32, #tpu.memory_space<vmem>>, vector<1x4x256xf32>
    %5 = vector.shape_cast %4 : vector<1x4x256xf32> to vector<4x256xf32>
    %c0_6 = arith.constant 0 : index
    %c128 = arith.constant 128 : index
    %6 = vector.load %arg11[%c0_6, %c128] : memref<8x512xf32, #tpu.memory_space<vmem>>, vector<4x256xf32>
    tpu.vector_store %arg11[%c0_6, %c128], %5 {strides = array<i32>} : memref<8x512xf32, #tpu.memory_space<vmem>>, vector<4x256xf32>,
    %c0_7 = arith.constant 0 : index
    %c111 = arith.constant 111 : index
    %7 = vector.load %arg11[%c0_7, %c111] : memref<8x512xf32, #tpu.memory_space<vmem>>, vector<4x256xf32>
    %c0_8 = arith.constant 0 : index
    %c0_9 = arith.constant 0 : index
    %c0_10 = arith.constant 0 : index
    %8 = vector.load %arg2[%c0_8, %c0_9, %c0_10] : memref<9x4x256xf32, #tpu.memory_space<vmem>>, vector<1x4x256xf32>
    %9 = vector.shape_cast %8 : vector<1x4x256xf32> to vector<4x256xf32>
    %10 = arith.mulf %7, %9 : vector<4x256xf32>
    %c0_11 = arith.constant 0 : index
    %c112 = arith.constant 112 : index
    %11 = vector.load %arg11[%c0_11, %c112] : memref<8x512xf32, #tpu.memory_space<vmem>>, vector<4x256xf32>
    %c1 = arith.constant 1 : index
    %c0_12 = arith.constant 0 : index
    %c0_13 = arith.constant 0 : index
    %12 = vector.load %arg2[%c1, %c0_12, %c0_13] : memref<9x4x256xf32, #tpu.memory_space<vmem>>, vector<1x4x256xf32>
    %13 = vector.shape_cast %12 : vector<1x4x256xf32> to vector<4x256xf32>
    %14 = arith.mulf %11, %13 : vector<4x256xf32>
    %15 = arith.addf %10, %14 : vector<4x256xf32>
    %c0_14 = arith.constant 0 : index
    %c113 = arith.constant 113 : index
    %16 = vector.load %arg11[%c0_14, %c113] : memref<8x512xf32, #tpu.memory_space<vmem>>, vector<4x256xf32>
    %c2 = arith.constant 2 : index
    %c0_15 = arith.constant 0 : index
    %c0_16 = arith.constant 0 : index
    %17 = vector.load %arg2[%c2, %c0_15, %c0_16] : memref<9x4x256xf32, #tpu.memory_space<vmem>>, vector<1x4x256xf32>
    %18 = vector.shape_cast %17 : vector<1x4x256xf32> to vector<4x256xf32>
    %19 = arith.mulf %16, %18 : vector<4x256xf32>
    %20 = arith.addf %15, %19 : vector<4x256xf32>
    %c0_17 = arith.constant 0 : index
    %c127 = arith.constant 127 : index
    %21 = vector.load %arg11[%c0_17, %c127] : memref<8x512xf32, #tpu.memory_space<vmem>>, vector<4x256xf32>
    %c3 = arith.constant 3 : index
    %c0_18 = arith.constant 0 : index
    %c0_19 = arith.constant 0 : index
    %22 = vector.load %arg2[%c3, %c0_18, %c0_19] : memref<9x4x256xf32, #tpu.memory_space<vmem>>, vector<1x4x256xf32>
    %23 = vector.shape_cast %22 : vector<1x4x256xf32> to vector<4x256xf32>
    %24 = arith.mulf %21, %23 : vector<4x256xf32>
    %c0_20 = arith.constant 0 : index
    %c128_21 = arith.constant 128 : index
    %25 = vector.load %arg11[%c0_20, %c128_21] : memref<8x512xf32, #tpu.memory_space<vmem>>, vector<4x256xf32>
    %c4 = arith.constant 4 : index
    %c0_22 = arith.constant 0 : index
    %c0_23 = arith.constant 0 : index
    %26 = vector.load %arg2[%c4, %c0_22, %c0_23] : memref<9x4x256xf32, #tpu.memory_space<vmem>>, vector<1x4x256xf32>
    %27 = vector.shape_cast %26 : vector<1x4x256xf32> to vector<4x256xf32>
    %28 = arith.mulf %25, %27 : vector<4x256xf32>
    %29 = arith.addf %24, %28 : vector<4x256xf32>
    %c0_24 = arith.constant 0 : index
    %c129 = arith.constant 129 : index
    %30 = vector.load %arg11[%c0_24, %c129] : memref<8x512xf32, #tpu.memory_space<vmem>>, vector<4x256xf32>
    %c5 = arith.constant 5 : index
    %c0_25 = arith.constant 0 : index
    %c0_26 = arith.constant 0 : index
    %31 = vector.load %arg2[%c5, %c0_25, %c0_26] : memref<9x4x256xf32, #tpu.memory_space<vmem>>, vector<1x4x256xf32>
    %32 = vector.shape_cast %31 : vector<1x4x256xf32> to vector<4x256xf32>
    %33 = arith.mulf %30, %32 : vector<4x256xf32>
    %34 = arith.addf %29, %33 : vector<4x256xf32>
    %c0_27 = arith.constant 0 : index
    %c143 = arith.constant 143 : index
    %35 = vector.load %arg11[%c0_27, %c143] : memref<8x512xf32, #tpu.memory_space<vmem>>, vector<4x256xf32>
    %c6 = arith.constant 6 : index
    %c0_28 = arith.constant 0 : index
    %c0_29 = arith.constant 0 : index
    %36 = vector.load %arg2[%c6, %c0_28, %c0_29] : memref<9x4x256xf32, #tpu.memory_space<vmem>>, vector<1x4x256xf32>
    %37 = vector.shape_cast %36 : vector<1x4x256xf32> to vector<4x256xf32>
    %38 = arith.mulf %35, %37 : vector<4x256xf32>
    %c0_30 = arith.constant 0 : index
    %c144 = arith.constant 144 : index
    %39 = vector.load %arg11[%c0_30, %c144] : memref<8x512xf32, #tpu.memory_space<vmem>>, vector<4x256xf32>
    %c7 = arith.constant 7 : index
    %c0_31 = arith.constant 0 : index
    %c0_32 = arith.constant 0 : index
    %40 = vector.load %arg2[%c7, %c0_31, %c0_32] : memref<9x4x256xf32, #tpu.memory_space<vmem>>, vector<1x4x256xf32>
    %41 = vector.shape_cast %40 : vector<1x4x256xf32> to vector<4x256xf32>
    %42 = arith.mulf %39, %41 : vector<4x256xf32>
    %43 = arith.addf %38, %42 : vector<4x256xf32>
    %c0_33 = arith.constant 0 : index
    %c145 = arith.constant 145 : index
    %44 = vector.load %arg11[%c0_33, %c145] : memref<8x512xf32, #tpu.memory_space<vmem>>, vector<4x256xf32>
    %c8 = arith.constant 8 : index
    %c0_34 = arith.constant 0 : index
    %c0_35 = arith.constant 0 : index
    %45 = vector.load %arg2[%c8, %c0_34, %c0_35] : memref<9x4x256xf32, #tpu.memory_space<vmem>>, vector<1x4x256xf32>
    %46 = vector.shape_cast %45 : vector<1x4x256xf32> to vector<4x256xf32>
    %47 = arith.mulf %44, %46 : vector<4x256xf32>
    %48 = arith.addf %43, %47 : vector<4x256xf32>
    %49 = arith.addf %20, %34 : vector<4x256xf32>
    %50 = arith.addf %49, %48 : vector<4x256xf32>
    %c0_36 = arith.constant 0 : index
    %c0_37 = arith.constant 0 : index
    %51 = vector.load %arg3[%c0_36, %c0_37] : memref<8x4xf32, #tpu.memory_space<vmem>>, vector<8x4xf32>
    %cst_38 = arith.constant dense<0.000000e+00> : vector<8x256xf32>
    %52 = tpu.matmul %51, %50, %cst_38 {dimension_numbers = #tpu.dot_dimension_numbers<[1], [0], [0], [1], [0, 0, 1, 1], [], []>} : vector<8x4xf32>, vector<4x256xf32>, vector<8x256xf32> -> vector<8x256xf32>
    %cst_39 = arith.constant 0.000000e+00 : f32
    %53 = vector.broadcast %cst_39 : f32 to vector<8x256xf32>
    %54 = arith.cmpf ogt, %52, %53 : vector<8x256xf32>
    %cst_40 = arith.constant 0.000000e+00 : f32
    %55 = vector.broadcast %cst_40 : f32 to vector<8x256xf32>
    %56 = arith.minimumf %52, %55 : vector<8x256xf32>
    %57 = math.exp %56 : vector<8x256xf32>
    %cst_41 = arith.constant 1.000000e+00 : f32
    %58 = vector.broadcast %cst_41 : f32 to vector<8x256xf32>
    %59 = arith.subf %57, %58 : vector<8x256xf32>
    %cst_42 = arith.constant 1.67326319 : f32
    %60 = vector.broadcast %cst_42 : f32 to vector<8x256xf32>
    %61 = arith.mulf %60, %59 : vector<8x256xf32>
    %62 = arith.select %54, %52, %61 : vector<8x256xi1>, vector<8x256xf32>
    %cst_43 = arith.constant 1.05070102 : f32
    %63 = vector.broadcast %cst_43 : f32 to vector<8x256xf32>
    %64 = arith.mulf %63, %62 : vector<8x256xf32>
    %c0_44 = arith.constant 0 : index
    %c128_45 = arith.constant 128 : index
    %65 = vector.load %arg11[%c0_44, %c128_45] : memref<8x512xf32, #tpu.memory_space<vmem>>, vector<8x256xf32>
    tpu.vector_store %arg11[%c0_44, %c128_45], %64 {strides = array<i32>} : memref<8x512xf32, #tpu.memory_space<vmem>>, vector<8x256xf32>,
    %c0_46 = arith.constant 0 : index
    %c111_47 = arith.constant 111 : index
    %66 = vector.load %arg11[%c0_46, %c111_47] : memref<8x512xf32, #tpu.memory_space<vmem>>, vector<8x256xf32>
    %c0_48 = arith.constant 0 : index
    %c0_49 = arith.constant 0 : index
    %c0_50 = arith.constant 0 : index
    %67 = vector.load %arg4[%c0_48, %c0_49, %c0_50] : memref<9x8x256xf32, #tpu.memory_space<vmem>>, vector<1x8x256xf32>
    %68 = vector.shape_cast %67 : vector<1x8x256xf32> to vector<8x256xf32>
    %69 = arith.mulf %66, %68 : vector<8x256xf32>
    %c0_51 = arith.constant 0 : index
    %c112_52 = arith.constant 112 : index
    %70 = vector.load %arg11[%c0_51, %c112_52] : memref<8x512xf32, #tpu.memory_space<vmem>>, vector<8x256xf32>
    %c1_53 = arith.constant 1 : index
    %c0_54 = arith.constant 0 : index
    %c0_55 = arith.constant 0 : index
    %71 = vector.load %arg4[%c1_53, %c0_54, %c0_55] : memref<9x8x256xf32, #tpu.memory_space<vmem>>, vector<1x8x256xf32>
    %72 = vector.shape_cast %71 : vector<1x8x256xf32> to vector<8x256xf32>
    %73 = arith.mulf %70, %72 : vector<8x256xf32>
    %74 = arith.addf %69, %73 : vector<8x256xf32>
    %c0_56 = arith.constant 0 : index
    %c113_57 = arith.constant 113 : index
    %75 = vector.load %arg11[%c0_56, %c113_57] : memref<8x512xf32, #tpu.memory_space<vmem>>, vector<8x256xf32>
    %c2_58 = arith.constant 2 : index
    %c0_59 = arith.constant 0 : index
    %c0_60 = arith.constant 0 : index
    %76 = vector.load %arg4[%c2_58, %c0_59, %c0_60] : memref<9x8x256xf32, #tpu.memory_space<vmem>>, vector<1x8x256xf32>
    %77 = vector.shape_cast %76 : vector<1x8x256xf32> to vector<8x256xf32>
    %78 = arith.mulf %75, %77 : vector<8x256xf32>
    %79 = arith.addf %74, %78 : vector<8x256xf32>
    %c0_61 = arith.constant 0 : index
    %c127_62 = arith.constant 127 : index
    %80 = vector.load %arg11[%c0_61, %c127_62] : memref<8x512xf32, #tpu.memory_space<vmem>>, vector<8x256xf32>
    %c3_63 = arith.constant 3 : index
    %c0_64 = arith.constant 0 : index
    %c0_65 = arith.constant 0 : index
    %81 = vector.load %arg4[%c3_63, %c0_64, %c0_65] : memref<9x8x256xf32, #tpu.memory_space<vmem>>, vector<1x8x256xf32>
    %82 = vector.shape_cast %81 : vector<1x8x256xf32> to vector<8x256xf32>
    %83 = arith.mulf %80, %82 : vector<8x256xf32>
    %c0_66 = arith.constant 0 : index
    %c128_67 = arith.constant 128 : index
    %84 = vector.load %arg11[%c0_66, %c128_67] : memref<8x512xf32, #tpu.memory_space<vmem>>, vector<8x256xf32>
    %c4_68 = arith.constant 4 : index
    %c0_69 = arith.constant 0 : index
    %c0_70 = arith.constant 0 : index
    %85 = vector.load %arg4[%c4_68, %c0_69, %c0_70] : memref<9x8x256xf32, #tpu.memory_space<vmem>>, vector<1x8x256xf32>
    %86 = vector.shape_cast %85 : vector<1x8x256xf32> to vector<8x256xf32>
    %87 = arith.mulf %84, %86 : vector<8x256xf32>
    %88 = arith.addf %83, %87 : vector<8x256xf32>
    %c0_71 = arith.constant 0 : index
    %c129_72 = arith.constant 129 : index
    %89 = vector.load %arg11[%c0_71, %c129_72] : memref<8x512xf32, #tpu.memory_space<vmem>>, vector<8x256xf32>
    %c5_73 = arith.constant 5 : index
    %c0_74 = arith.constant 0 : index
    %c0_75 = arith.constant 0 : index
    %90 = vector.load %arg4[%c5_73, %c0_74, %c0_75] : memref<9x8x256xf32, #tpu.memory_space<vmem>>, vector<1x8x256xf32>
    %91 = vector.shape_cast %90 : vector<1x8x256xf32> to vector<8x256xf32>
    %92 = arith.mulf %89, %91 : vector<8x256xf32>
    %93 = arith.addf %88, %92 : vector<8x256xf32>
    %c0_76 = arith.constant 0 : index
    %c143_77 = arith.constant 143 : index
    %94 = vector.load %arg11[%c0_76, %c143_77] : memref<8x512xf32, #tpu.memory_space<vmem>>, vector<8x256xf32>
    %c6_78 = arith.constant 6 : index
    %c0_79 = arith.constant 0 : index
    %c0_80 = arith.constant 0 : index
    %95 = vector.load %arg4[%c6_78, %c0_79, %c0_80] : memref<9x8x256xf32, #tpu.memory_space<vmem>>, vector<1x8x256xf32>
    %96 = vector.shape_cast %95 : vector<1x8x256xf32> to vector<8x256xf32>
    %97 = arith.mulf %94, %96 : vector<8x256xf32>
    %c0_81 = arith.constant 0 : index
    %c144_82 = arith.constant 144 : index
    %98 = vector.load %arg11[%c0_81, %c144_82] : memref<8x512xf32, #tpu.memory_space<vmem>>, vector<8x256xf32>
    %c7_83 = arith.constant 7 : index
    %c0_84 = arith.constant 0 : index
    %c0_85 = arith.constant 0 : index
    %99 = vector.load %arg4[%c7_83, %c0_84, %c0_85] : memref<9x8x256xf32, #tpu.memory_space<vmem>>, vector<1x8x256xf32>
    %100 = vector.shape_cast %99 : vector<1x8x256xf32> to vector<8x256xf32>
    %101 = arith.mulf %98, %100 : vector<8x256xf32>
    %102 = arith.addf %97, %101 : vector<8x256xf32>
    %c0_86 = arith.constant 0 : index
    %c145_87 = arith.constant 145 : index
    %103 = vector.load %arg11[%c0_86, %c145_87] : memref<8x512xf32, #tpu.memory_space<vmem>>, vector<8x256xf32>
    %c8_88 = arith.constant 8 : index
    %c0_89 = arith.constant 0 : index
    %c0_90 = arith.constant 0 : index
    %104 = vector.load %arg4[%c8_88, %c0_89, %c0_90] : memref<9x8x256xf32, #tpu.memory_space<vmem>>, vector<1x8x256xf32>
    %105 = vector.shape_cast %104 : vector<1x8x256xf32> to vector<8x256xf32>
    %106 = arith.mulf %103, %105 : vector<8x256xf32>
    %107 = arith.addf %102, %106 : vector<8x256xf32>
    %108 = arith.addf %79, %93 : vector<8x256xf32>
    %109 = arith.addf %108, %107 : vector<8x256xf32>
    %c0_91 = arith.constant 0 : index
    %c0_92 = arith.constant 0 : index
    %110 = vector.load %arg5[%c0_91, %c0_92] : memref<8x8xf32, #tpu.memory_space<vmem>>, vector<8x8xf32>
    %cst_93 = arith.constant dense<0.000000e+00> : vector<8x256xf32>
    %111 = tpu.matmul %110, %109, %cst_93 {dimension_numbers = #tpu.dot_dimension_numbers<[1], [0], [0], [1], [0, 0, 1, 1], [], []>} : vector<8x8xf32>, vector<8x256xf32>, vector<8x256xf32> -> vector<8x256xf32>
    %cst_94 = arith.constant 0.000000e+00 : f32
    %112 = vector.broadcast %cst_94 : f32 to vector<8x256xf32>
    %113 = arith.cmpf ogt, %111, %112 : vector<8x256xf32>
    %cst_95 = arith.constant 0.000000e+00 : f32
    %114 = vector.broadcast %cst_95 : f32 to vector<8x256xf32>
    %115 = arith.minimumf %111, %114 : vector<8x256xf32>
    %116 = math.exp %115 : vector<8x256xf32>
    %cst_96 = arith.constant 1.000000e+00 : f32
    %117 = vector.broadcast %cst_96 : f32 to vector<8x256xf32>
    %118 = arith.subf %116, %117 : vector<8x256xf32>
    %cst_97 = arith.constant 1.67326319 : f32
    %119 = vector.broadcast %cst_97 : f32 to vector<8x256xf32>
    %120 = arith.mulf %119, %118 : vector<8x256xf32>
    %121 = arith.select %113, %111, %120 : vector<8x256xi1>, vector<8x256xf32>
    %cst_98 = arith.constant 1.05070102 : f32
    %122 = vector.broadcast %cst_98 : f32 to vector<8x256xf32>
    %123 = arith.mulf %122, %121 : vector<8x256xf32>
    %c0_99 = arith.constant 0 : index
    %c128_100 = arith.constant 128 : index
    %124 = vector.load %arg11[%c0_99, %c128_100] : memref<8x512xf32, #tpu.memory_space<vmem>>, vector<8x256xf32>
    tpu.vector_store %arg11[%c0_99, %c128_100], %123 {strides = array<i32>} : memref<8x512xf32, #tpu.memory_space<vmem>>, vector<8x256xf32>,
    %c0_101 = arith.constant 0 : index
    %c111_102 = arith.constant 111 : index
    %125 = vector.load %arg11[%c0_101, %c111_102] : memref<8x512xf32, #tpu.memory_space<vmem>>, vector<8x256xf32>
    %c0_103 = arith.constant 0 : index
    %c0_104 = arith.constant 0 : index
    %c0_105 = arith.constant 0 : index
    %126 = vector.load %arg6[%c0_103, %c0_104, %c0_105] : memref<9x8x256xf32, #tpu.memory_space<vmem>>, vector<1x8x256xf32>
    %127 = vector.shape_cast %126 : vector<1x8x256xf32> to vector<8x256xf32>
    %128 = arith.mulf %125, %127 : vector<8x256xf32>
    %c0_106 = arith.constant 0 : index
    %c112_107 = arith.constant 112 : index
    %129 = vector.load %arg11[%c0_106, %c112_107] : memref<8x512xf32, #tpu.memory_space<vmem>>, vector<8x256xf32>
    %c1_108 = arith.constant 1 : index
    %c0_109 = arith.constant 0 : index
    %c0_110 = arith.constant 0 : index
    %130 = vector.load %arg6[%c1_108, %c0_109, %c0_110] : memref<9x8x256xf32, #tpu.memory_space<vmem>>, vector<1x8x256xf32>
    %131 = vector.shape_cast %130 : vector<1x8x256xf32> to vector<8x256xf32>
    %132 = arith.mulf %129, %131 : vector<8x256xf32>
    %133 = arith.addf %128, %132 : vector<8x256xf32>
    %c0_111 = arith.constant 0 : index
    %c113_112 = arith.constant 113 : index
    %134 = vector.load %arg11[%c0_111, %c113_112] : memref<8x512xf32, #tpu.memory_space<vmem>>, vector<8x256xf32>
    %c2_113 = arith.constant 2 : index
    %c0_114 = arith.constant 0 : index
    %c0_115 = arith.constant 0 : index
    %135 = vector.load %arg6[%c2_113, %c0_114, %c0_115] : memref<9x8x256xf32, #tpu.memory_space<vmem>>, vector<1x8x256xf32>
    %136 = vector.shape_cast %135 : vector<1x8x256xf32> to vector<8x256xf32>
    %137 = arith.mulf %134, %136 : vector<8x256xf32>
    %138 = arith.addf %133, %137 : vector<8x256xf32>
    %c0_116 = arith.constant 0 : index
    %c127_117 = arith.constant 127 : index
    %139 = vector.load %arg11[%c0_116, %c127_117] : memref<8x512xf32, #tpu.memory_space<vmem>>, vector<8x256xf32>
    %c3_118 = arith.constant 3 : index
    %c0_119 = arith.constant 0 : index
    %c0_120 = arith.constant 0 : index
    %140 = vector.load %arg6[%c3_118, %c0_119, %c0_120] : memref<9x8x256xf32, #tpu.memory_space<vmem>>, vector<1x8x256xf32>
    %141 = vector.shape_cast %140 : vector<1x8x256xf32> to vector<8x256xf32>
    %142 = arith.mulf %139, %141 : vector<8x256xf32>
    %c0_121 = arith.constant 0 : index
    %c128_122 = arith.constant 128 : index
    %143 = vector.load %arg11[%c0_121, %c128_122] : memref<8x512xf32, #tpu.memory_space<vmem>>, vector<8x256xf32>
    %c4_123 = arith.constant 4 : index
    %c0_124 = arith.constant 0 : index
    %c0_125 = arith.constant 0 : index
    %144 = vector.load %arg6[%c4_123, %c0_124, %c0_125] : memref<9x8x256xf32, #tpu.memory_space<vmem>>, vector<1x8x256xf32>
    %145 = vector.shape_cast %144 : vector<1x8x256xf32> to vector<8x256xf32>
    %146 = arith.mulf %143, %145 : vector<8x256xf32>
    %147 = arith.addf %142, %146 : vector<8x256xf32>
    %c0_126 = arith.constant 0 : index
    %c129_127 = arith.constant 129 : index
    %148 = vector.load %arg11[%c0_126, %c129_127] : memref<8x512xf32, #tpu.memory_space<vmem>>, vector<8x256xf32>
    %c5_128 = arith.constant 5 : index
    %c0_129 = arith.constant 0 : index
    %c0_130 = arith.constant 0 : index
    %149 = vector.load %arg6[%c5_128, %c0_129, %c0_130] : memref<9x8x256xf32, #tpu.memory_space<vmem>>, vector<1x8x256xf32>
    %150 = vector.shape_cast %149 : vector<1x8x256xf32> to vector<8x256xf32>
    %151 = arith.mulf %148, %150 : vector<8x256xf32>
    %152 = arith.addf %147, %151 : vector<8x256xf32>
    %c0_131 = arith.constant 0 : index
    %c143_132 = arith.constant 143 : index
    %153 = vector.load %arg11[%c0_131, %c143_132] : memref<8x512xf32, #tpu.memory_space<vmem>>, vector<8x256xf32>
    %c6_133 = arith.constant 6 : index
    %c0_134 = arith.constant 0 : index
    %c0_135 = arith.constant 0 : index
    %154 = vector.load %arg6[%c6_133, %c0_134, %c0_135] : memref<9x8x256xf32, #tpu.memory_space<vmem>>, vector<1x8x256xf32>
    %155 = vector.shape_cast %154 : vector<1x8x256xf32> to vector<8x256xf32>
    %156 = arith.mulf %153, %155 : vector<8x256xf32>
    %c0_136 = arith.constant 0 : index
    %c144_137 = arith.constant 144 : index
    %157 = vector.load %arg11[%c0_136, %c144_137] : memref<8x512xf32, #tpu.memory_space<vmem>>, vector<8x256xf32>
    %c7_138 = arith.constant 7 : index
    %c0_139 = arith.constant 0 : index
    %c0_140 = arith.constant 0 : index
    %158 = vector.load %arg6[%c7_138, %c0_139, %c0_140] : memref<9x8x256xf32, #tpu.memory_space<vmem>>, vector<1x8x256xf32>
    %159 = vector.shape_cast %158 : vector<1x8x256xf32> to vector<8x256xf32>
    %160 = arith.mulf %157, %159 : vector<8x256xf32>
    %161 = arith.addf %156, %160 : vector<8x256xf32>
    %c0_141 = arith.constant 0 : index
    %c145_142 = arith.constant 145 : index
    %162 = vector.load %arg11[%c0_141, %c145_142] : memref<8x512xf32, #tpu.memory_space<vmem>>, vector<8x256xf32>
    %c8_143 = arith.constant 8 : index
    %c0_144 = arith.constant 0 : index
    %c0_145 = arith.constant 0 : index
    %163 = vector.load %arg6[%c8_143, %c0_144, %c0_145] : memref<9x8x256xf32, #tpu.memory_space<vmem>>, vector<1x8x256xf32>
    %164 = vector.shape_cast %163 : vector<1x8x256xf32> to vector<8x256xf32>
    %165 = arith.mulf %162, %164 : vector<8x256xf32>
    %166 = arith.addf %161, %165 : vector<8x256xf32>
    %167 = arith.addf %138, %152 : vector<8x256xf32>
    %168 = arith.addf %167, %166 : vector<8x256xf32>
    %c0_146 = arith.constant 0 : index
    %c0_147 = arith.constant 0 : index
    %169 = vector.load %arg9[%c0_146, %c0_147] : memref<256x64xf32, #tpu.memory_space<vmem>>, vector<256x64xf32>
    %cst_148 = arith.constant dense<0.000000e+00> : vector<8x64xf32>
    %170 = tpu.matmul %168, %169, %cst_148 {dimension_numbers = #tpu.dot_dimension_numbers<[1], [0], [0], [1], [0, 0, 1, 1], [], []>} : vector<8x256xf32>, vector<256x64xf32>, vector<8x64xf32> -> vector<8x64xf32>
    %c0_149 = arith.constant 0 : index
    %c0_150 = arith.constant 0 : index
    %171 = vector.load %arg9[%c0_149, %c0_150] : memref<256x64xf32, #tpu.memory_space<vmem>>, vector<256x64xf32>
    %cst_151 = arith.constant dense<0.000000e+00> : vector<4x64xf32>
    %172 = tpu.matmul %5, %171, %cst_151 {dimension_numbers = #tpu.dot_dimension_numbers<[1], [0], [0], [1], [0, 0, 1, 1], [], []>} : vector<4x256xf32>, vector<256x64xf32>, vector<4x64xf32> -> vector<4x64xf32>
    %c0_152 = arith.constant 0 : index
    %c0_153 = arith.constant 0 : index
    %173 = vector.load %arg7[%c0_152, %c0_153] : memref<8x8xf32, #tpu.memory_space<vmem>>, vector<8x8xf32>
    %cst_154 = arith.constant dense<0.000000e+00> : vector<8x64xf32>
    %174 = tpu.matmul %173, %170, %cst_154 {dimension_numbers = #tpu.dot_dimension_numbers<[1], [0], [0], [1], [0, 0, 1, 1], [], []>} : vector<8x8xf32>, vector<8x64xf32>, vector<8x64xf32> -> vector<8x64xf32>
    %c0_155 = arith.constant 0 : index
    %c0_156 = arith.constant 0 : index
    %175 = vector.load %arg8[%c0_155, %c0_156] : memref<8x4xf32, #tpu.memory_space<vmem>>, vector<8x4xf32>
    %cst_157 = arith.constant dense<0.000000e+00> : vector<8x64xf32>
    %176 = tpu.matmul %175, %172, %cst_157 {dimension_numbers = #tpu.dot_dimension_numbers<[1], [0], [0], [1], [0, 0, 1, 1], [], []>} : vector<8x4xf32>, vector<4x64xf32>, vector<8x64xf32> -> vector<8x64xf32>
    %177 = arith.addf %174, %176 : vector<8x64xf32>
    %cst_158 = arith.constant 0.000000e+00 : f32
    %178 = vector.broadcast %cst_158 : f32 to vector<8x64xf32>
    %179 = arith.cmpf ogt, %177, %178 : vector<8x64xf32>
    %cst_159 = arith.constant 0.000000e+00 : f32
    %180 = vector.broadcast %cst_159 : f32 to vector<8x64xf32>
    %181 = arith.minimumf %177, %180 : vector<8x64xf32>
    %182 = math.exp %181 : vector<8x64xf32>
    %cst_160 = arith.constant 1.000000e+00 : f32
    %183 = vector.broadcast %cst_160 : f32 to vector<8x64xf32>
    %184 = arith.subf %182, %183 : vector<8x64xf32>
    %cst_161 = arith.constant 1.67326319 : f32
    %185 = vector.broadcast %cst_161 : f32 to vector<8x64xf32>
    %186 = arith.mulf %185, %184 : vector<8x64xf32>
    %187 = arith.select %179, %177, %186 : vector<8x64xi1>, vector<8x64xf32>
    %cst_162 = arith.constant 1.05070102 : f32
    %188 = vector.broadcast %cst_162 : f32 to vector<8x64xf32>
    %189 = arith.mulf %188, %187 : vector<8x64xf32>
    %c0_163 = arith.constant 0 : index
    %c0_164 = arith.constant 0 : index
    %c0_165 = arith.constant 0 : index
    %190 = vector.load %arg10[%c0_163, %c0_164, %c0_165] : memref<1x8x64xf32, #tpu.memory_space<vmem>>, vector<1x8x64xf32>
    %191 = vector.shape_cast %190 : vector<1x8x64xf32> to vector<8x64xf32>
    %192 = vector.shape_cast %189 : vector<8x64xf32> to vector<1x8x64xf32>
    tpu.vector_store %arg10[%c0_163, %c0_164, %c0_165], %192 {strides = array<i32>} : memref<1x8x64xf32, #tpu.memory_space<vmem>>, vector<1x8x64xf32>,
    return
  }
  func.func @transform_0(%arg0: i32) -> (i32, i32, i32) {
    %c0_i32 = arith.constant 0 : i32
    %c0_i32_0 = arith.constant 0 : i32
    %c0_i32_1 = arith.constant 0 : i32
    return %arg0, %c0_i32, %c0_i32_0 : i32, i32, i32
  }
  func.func @transform_1(%arg0: i32) -> (i32, i32, i32) {
    %c0_i32 = arith.constant 0 : i32
    %c0_i32_0 = arith.constant 0 : i32
    %c0_i32_1 = arith.constant 0 : i32
    %c0_i32_2 = arith.constant 0 : i32
    return %c0_i32, %c0_i32_0, %c0_i32_1 : i32, i32, i32
  }
  func.func @transform_2(%arg0: i32) -> (i32, i32) {
    %c0_i32 = arith.constant 0 : i32
    %c0_i32_0 = arith.constant 0 : i32
    %c0_i32_1 = arith.constant 0 : i32
    return %c0_i32, %c0_i32_0 : i32, i32
  }
  func.func @transform_3(%arg0: i32) -> (i32, i32, i32) {
    %c0_i32 = arith.constant 0 : i32
    %c0_i32_0 = arith.constant 0 : i32
    %c0_i32_1 = arith.constant 0 : i32
    %c0_i32_2 = arith.constant 0 : i32
    return %c0_i32, %c0_i32_0, %c0_i32_1 : i32, i32, i32
  }
  func.func @transform_4(%arg0: i32) -> (i32, i32) {
    %c0_i32 = arith.constant 0 : i32
    %c0_i32_0 = arith.constant 0 : i32
    %c0_i32_1 = arith.constant 0 : i32
    return %c0_i32, %c0_i32_0 : i32, i32
  }
  func.func @transform_5(%arg0: i32) -> (i32, i32, i32) {
    %c0_i32 = arith.constant 0 : i32
    %c0_i32_0 = arith.constant 0 : i32
    %c0_i32_1 = arith.constant 0 : i32
    %c0_i32_2 = arith.constant 0 : i32
    return %c0_i32, %c0_i32_0, %c0_i32_1 : i32, i32, i32
  }
  func.func @transform_6(%arg0: i32) -> (i32, i32) {
    %c0_i32 = arith.constant 0 : i32
    %c0_i32_0 = arith.constant 0 : i32
    %c0_i32_1 = arith.constant 0 : i32
    return %c0_i32, %c0_i32_0 : i32, i32
  }
  func.func @transform_7(%arg0: i32) -> (i32, i32) {
    %c0_i32 = arith.constant 0 : i32
    %c0_i32_0 = arith.constant 0 : i32
    %c0_i32_1 = arith.constant 0 : i32
    return %c0_i32, %c0_i32_0 : i32, i32
  }
  func.func @transform_8(%arg0: i32) -> (i32, i32) {
    %c0_i32 = arith.constant 0 : i32
    %c0_i32_0 = arith.constant 0 : i32
    %c0_i32_1 = arith.constant 0 : i32
    return %c0_i32, %c0_i32_0 : i32, i32
  }
  func.func @transform_9(%arg0: i32) -> (i32, i32, i32) {
    %c0_i32 = arith.constant 0 : i32
    %c0_i32_0 = arith.constant 0 : i32
    %c0_i32_1 = arith.constant 0 : i32
    return %arg0, %c0_i32, %c0_i32_0 : i32, i32, i32
  }
}

</mosaic_0001>

<bundles_post_ra>
// kernel: tpu_custom_call.1
= control target key start
LH: loop header
LB: loop body
LE: loop exit
PB: predicated region body
PF: predicated region fallthrough
CT: control target
= control target key end

     0   :  { %s2780_s0 = inlined_call_operand.vmem [shape: f32[2,4,256], index: 0, kind: input, shape index: {}]   ;;  %s2781_s1 = inlined_call_operand.vmem [shape: f32[9,4,256], index: 1, kind: input, shape index: {}]   ;;  %s2782_s2 = inlined_call_operand.vmem [shape: f32[8,4], index: 2, kind: input, shape index: {}]   ;;  %s2783_s3 = inlined_call_operand.vmem [shape: f32[9,8,256], index: 3, kind: input, shape index: {}]   ;;  %s2784_s4 = inlined_call_operand.vmem [shape: f32[8,8], index: 4, kind: input, shape index: {}]   ;;  %s2785_s5 = inlined_call_operand.vmem [shape: f32[9,8,256], index: 5, kind: input, shape index: {}]   ;;  %s2786_s6 = inlined_call_operand.vmem [shape: f32[8,8], index: 6, kind: input, shape index: {}]   ;;  %s2787_s7 = inlined_call_operand.vmem [shape: f32[8,4], index: 7, kind: input, shape index: {}]   ;;  %s2788_s8 = inlined_call_operand.vmem [shape: f32[256,64], index: 8, kind: input, shape index: {}]   ;;  %s2789_s9 = inlined_call_operand.hbm [shape: f32[2,8,64], index: 9, kind: output, shape index: {}]  }
   0x1   :  { %2810 = sst [smem:[#allocation6_spill]] %s2780_s0 }
   0x2   :  { %2811 = sst [smem:[#allocation7_spill]] %s2781_s1 }
   0x3   :  { %2812 = sst [smem:[#allocation8_spill]] %s2782_s2 }
   0x4   :  { %2813 = sst [smem:[#allocation9_spill]] %s2783_s3 }
   0x5   :  { %14 = vsyncpa [#allocation4], 0 }
   0x6   :  { %16 = vsyncpa [#allocation4 + $0x1], 0  ;;  %s2139_s30 = smov 0   ;;  %s2141_s10 = smov 0  }
   0x7   :  { %s2143_s11 = smov 0   ;;  %s2145_s12 = smov 0  }
   0x8 LB: > { %s2160_s13 = sadd.s32 4294967295, %s2074_s12   ;;  %s1789_s14 = sadd.s32 4294967294, %s2074_s12   ;;  %s2074_s12 = sphi %s2145_s12, %s2833_s12   ;;  %s2070_s11 = sphi %s2143_s11, %s2832_s11   ;;  %s2066_s10 = sphi %s2141_s10, %s2831_s10   ;;  %s2062_s30 = sphi %s2139_s30, %s2830_s30  }
   0x9   : > { %s2164_s15 = sadd.s32 1, %s2074_s12   ;;  %s223_s16 = sadd.s32 1, %s2070_s11 }
   0xa   : > { %s220_s17 = ssub.s32 %s2074_s12, %s2164_s15  ;;  %p233_p0 = scmp.ne.s32.totalorder %s2070_s11, %s2066_s10 }
   0xb   : > { %p221_p1 = scmp.eq.s32.totalorder %s220_s17, 0  ;;  %p234_p2 = scmp.eq.s32.totalorder %s2160_s13, 1 }
   0xc   : > { %p239_p3 = scmp.ne.s32.totalorder %s2066_s10, %s2062_s30  ;;  %p240_p4 = scmp.eq.s32.totalorder %s1789_s14, 1 }
   0xd   : > { %s2175_s18 = scalar_select %p221_p1, %s2070_s11, %s223_s16  }
   0xe   : > { %p2177_p5 = por %p234_p2, %p233_p0  ;;  %p2181_p6 = por %p240_p4, %p239_p3 }
   0xf   : > { %p1792_p7 = scmp.ge.s32.totalorder %s2074_s12, 1  ;;  %p290_p8 = scmp.lt.s32.totalorder %s2074_s12, 3 }
  0x11   : > { %p291_p9 = pnand %p1792_p7, %p290_p8 }
  0x12   : > { %s2816_s1 = sld [smem:[#allocation7_spill]] (!%p291_p9)  ;;  %s2802_s25 = smov (!%p291_p9), 16  }
  0x13   : > { %294 = sbr.rel (%p291_p9) target bundleno = 2138 (0x85a), region = 56  ;;  %s2804_s26 = smov (!%p291_p9), 1  }
  0x14   : > { %p326_p10 = scmp.lt.s32.totalorder (!%p291_p9), %s2160_s13, 1  ;;  %s2817_s0 = sld [smem:[#allocation6_spill]] (!%p291_p9) }
  0x15   : > { %s2808_s24 = smov (!%p291_p9), 17   ;;  %s2800_s22 = smov (!%p291_p9), 127  }
  0x16   : > { %s2796_s14 = smov (!%p291_p9), 15   ;;  %s2794_s16 = smov (!%p291_p9), 126  }
  0x17   : > { %s2792_s27 = smov (!%p291_p9), 111   ;;  %s2790_s28 = smov (!%p291_p9), 96  }
  0x18   : > { %v1802_v0 = vld [vmem:[%s2816_s1 + $0x38] sm:$0xff]  ;;  %v1800_v1 = vld [vmem:[%s2816_s1 + $0x28] sm:$0xff]  ;;  %v1803_v4 = vld [vmem:[%s2816_s1 + $0x40] sm:$0xff]  ;;  %v2078_v5 = vmov 0.0   ;;  %s327_s29 = scalar_select %p326_p10, %s2160_s13, 1  ;;  %vm471_vm0 = vcmask 7168  }
  0x19   : > { %516 = vrot.lane.b32.xlu1 %v1802_v0, %s2802_s25  ;;  %v515_v2 = vcombine.high %v1802_v0, %v1802_v0  ;;  %467 = vrot.lane.b32.xlu0 %v1800_v1, %s2804_s26  ;;  %v466_v3 = vcombine.high %v1800_v1, %v1800_v1  ;;  %332 = vst [vmem:[#allocation2] sm:$0xff] %v2078_v5  ;;  %331 = vst [vmem:[#allocation2 + $0x8] sm:$0xff] %v2078_v5  ;;  %v1796_v7 = vld [vmem:[%s2816_s1 + $0x8] sm:$0xff]  ;;  %v1798_v10 = vld [vmem:[%s2816_s1 + $0x18] sm:$0xff]  ;;  %vm553_vm1 = vcmask 138240   ;;  %vm520_vm2 = vcmask 130048  }
  0x1a   : > { %698 = vmatprep.mubr.f32.mxu0 %v2078_v5  ;;  %1075 = vmatprep.mubr.f32.mxu1 %v2078_v5  ;;  %v548_v6 = vcombine.high %v1803_v4, %v1803_v4  ;;  %s1852_s17 = sshll.u32 %s327_s29, 3  ;;  %v360_v8 = vcombine.high %v1796_v7, %v1796_v7  ;;  %s2806_s29 = smov 112   ;;  %v428_v12 = vcombine.high %v1798_v10, %v1798_v10  ;;  %v1797_v13 = vld [vmem:[%s2816_s1 + $0x10] sm:$0xff]  ;;  %v1799_v14 = vld [vmem:[%s2816_s1 + $0x20] sm:$0xff]  ;;  %vm365_vm3 = vcmask 916480  }
  0x1b   : > { %s330_s23 = scalar_lea.vmem %s2817_s0, %s1852_s17  ;;  %v394_v15 = vcombine.high %v1797_v13, %v1797_v13  ;;  %v443_v16 = vcombine.high %v1799_v14, %v1799_v14  ;;  %v1801_v21 = vld [vmem:[%s2816_s1 + $0x30] sm:$0xff]  ;;  %v342_v45 = vld [vmem:[%s2816_s1] sm:$0xff]  ;;  %vm399_vm4 = vcmask 924672   ;;  %vm382_vm5 = vcmask 1039360   ;;  %s2818_s3 = sld [smem:[#allocation9_spill]] }
  0x1c   : > { %v2210_v9 = vld [vmem:[%s330_s23] sm:$0xff]  ;;  %s2798_s23 = smov 113   ;;  %v499_v22 = vcombine.high %v1801_v21, %v1801_v21  ;;  %v344_v52 = vcombine.high %v342_v45, %v342_v45  ;;  %vm416_vm6 = vcmask 1031168   ;;  %vm504_vm7 = vcmask 121856   ;;  %s2820_s17 = smov 113  }
  0x1d   : > { %518 = vrot.lane.b32.xlu1 %v515_v2, %s2802_s25  ;;  %469 = vrot.lane.b32.xlu0 %v466_v3, %s2804_s26  ;;  %337 = vst [vmem:[#allocation2 + $0x10] sm:$0xf] %v2210_v9  ;;  %v2218_v11 = vcombine.high %v2210_v9, %v2210_v9  ;;  %vm349_vm8 = vcmask 908288   ;;  %vm604_vm9 = vcmask 785408   ;;  %vm629_vm10 = vcmask 1043456   ;;  %s2822_s2 = sld [smem:[#allocation8_spill]] }
  0x1e   : > { %vm625_vm11 = vcmask 31744   ;;  %s2828_s0 = smov 17   ;;  %vm1007_vm14 = vcmask 64512   ;;  %s2088_s1 = smov [#allocation3]  }
  0x1f   : > { %338 = vst [vmem:[#allocation2 + $0x18] sm:$0xf] %v2218_v11 }
  0x20   : > { %v2250_v28 = vld [vmem:[#allocation2] sm:$0xf]  ;;  %v2269_v44 = vld [vmem:[#allocation2 + $0x8] sm:$0xf] }
  0x21   : > { %551 = vrot.lane.b32.xlu1 %v548_v6, %s2808_s24  ;;  %549 = vrot.lane.b32.xlu0 %v1803_v4, %s2808_s24 }
  0x24   : > { %v2231_v17 = vld [vmem:[#allocation2 + $0x10] sm:$0xf] }
  0x25   : > { %363 = vrot.lane.b32.xlu1 %v360_v8, %s2806_s29  ;;  %361 = vrot.lane.b32.xlu0 %v1796_v7, %s2806_s29  ;;  %v445_v19 = vmul.f32 %v1799_v14, %v2231_v17  ;;  %v2246_v23 = vld [vmem:[#allocation2 + $0x10] sm:$0xf] }
  0x26   : > { %v2233_v18 = vld [vmem:[#allocation2 + $0x18] sm:$0xf] }
  0x27   : > { %v446_v20 = vmul.f32 %v443_v16, %v2233_v18  ;;  %v2256_v33 = vld [vmem:[#allocation2 + $0x18] sm:$0xf] }
  0x29   : > { %431 = vrot.lane.b32.xlu1 %v428_v12, %s2800_s22  ;;  %429 = vrot.lane.b32.xlu0 %v1798_v10, %s2800_s22 }
  0x2d   : > { %397 = vrot.lane.b32.xlu1 %v394_v15, %s2798_s23  ;;  %395 = vrot.lane.b32.xlu0 %v1797_v13, %s2798_s23  ;;  %s2824_s23 = smov 111  }
  0x31   : > { %449 = vrot.lane.b32.xlu0 %v445_v19, %s2800_s22  ;;  %451 = vrot.lane.b32.xlu1 %v446_v20, %s2800_s22 }
  0x35   : > { %500 = vrot.lane.b32.xlu0 %v1801_v21, %s2796_s14  ;;  %502 = vrot.lane.b32.xlu1 %v499_v22, %s2796_s14  ;;  %s2819_s14 = smov 127  }
  0x8b   : > { %v517_v24 = vpop.permute.xlu1 %516  ;;  %v468_v25 = vpop.permute.xlu0 %467 }
  0x8c   : > { %v525_v26 = vmul.f32 %v517_v24, %v2246_v23  ;;  %v476_v27 = vmul.f32 %v468_v25, %v2246_v23 }
  0x8e   : > { %482 = vrot.lane.b32.xlu0 %v476_v27, %s2794_s16  ;;  %531 = vrot.lane.b32.xlu1 %v525_v26, %s2800_s22 }
  0x8f   : > { %v519_v29 = vpop.permute.xlu1 %518  ;;  %v470_v30 = vpop.permute.xlu0 %469 }
  0x90   : > { %v527_v31 = vmul.f32 %v519_v29, %v2250_v28  ;;  %v472_v32 = vsel %vm471_vm0, %v468_v25, %v470_v30  ;;  %v478_v40 = vmul.f32 %v470_v30, %v2250_v28  ;;  %v521_v42 = vsel %vm520_vm2, %v517_v24, %v519_v29 }
  0x91   : > { %v477_v37 = vmul.f32 %v472_v32, %v2256_v33  ;;  %v526_v47 = vmul.f32 %v521_v42, %v2256_v33 }
  0x92   : > { %535 = vrot.lane.b32.xlu1 %v527_v31, %s2800_s22 }
  0x93   : > { %v552_v34 = vpop.permute.xlu1 %551  ;;  %v550_v35 = vpop.permute.xlu0 %549 }
  0x94   : > { %v558_v36 = vmul.f32 %v550_v35, %v2246_v23  ;;  %v554_v38 = vsel %vm553_vm1, %v550_v35, %v552_v34  ;;  %v560_v50 = vmul.f32 %v552_v34, %v2250_v28 }
  0x95   : > { %v559_v41 = vmul.f32 %v554_v38, %v2256_v33 }
  0x96   : > { %564 = vrot.lane.b32.xlu0 %v558_v36, %s2794_s16  ;;  %484 = vrot.lane.b32.xlu1 %v477_v37, %s2794_s16 }
  0x97   : > { %v364_v39 = vpop.permute.xlu1 %363  ;;  %v362_v43 = vpop.permute.xlu0 %361 }
  0x98   : > { %v370_v48 = vmul.f32 %v362_v43, %v2269_v44  ;;  %v366_v54 = vsel %vm365_vm3, %v362_v43, %v364_v39  ;;  %v372_v55 = vmul.f32 %v364_v39, %v2233_v18 }
  0x99   : > { %v371_v56 = vmul.f32 %v366_v54, %v2231_v17 }
  0x9a   : > { %486 = vrot.lane.b32.xlu0 %v478_v40, %s2794_s16  ;;  %566 = vrot.lane.b32.xlu1 %v559_v41, %s2794_s16 }
  0x9b   : > { %v432_v46 = vpop.permute.xlu1 %431  ;;  %v430_v51 = vpop.permute.xlu0 %429 }
  0x9c   : > { %v437_v1 = vmul.f32 %v430_v51, %v2269_v44  ;;  %v433_v5 = vsel %vm382_vm5, %v430_v51, %v432_v46  ;;  %v439_v12 = vmul.f32 %v432_v46, %v2233_v18 }
  0x9d   : > { %v438_v7 = vmul.f32 %v433_v5, %v2231_v17 }
  0x9e   : > { %533 = vrot.lane.b32.xlu0 %v526_v47, %s2800_s22  ;;  %345 = vrot.lane.b32.xlu1 %v342_v45, %s2792_s27 }
  0x9f   : > { %v398_v49 = vpop.permute.xlu1 %397  ;;  %v396_v57 = vpop.permute.xlu0 %395 }
  0xa0   : > { %v406_v53 = vmul.f32 %v398_v49, %v2233_v18  ;;  %v404_v58 = vmul.f32 %v396_v57, %v2269_v44  ;;  %v400_v59 = vsel %vm399_vm4, %v396_v57, %v398_v49 }
  0xa1   : > { %v405_v60 = vmul.f32 %v400_v59, %v2231_v17 }
  0xa2   : > { %568 = vrot.lane.b32.xlu0 %v560_v50, %s2794_s16  ;;  %376 = vrot.lane.b32.xlu1 %v370_v48, %s2800_s22 }
  0xa3   : > { %v450_v61 = vpop.permute.xlu0 %449  ;;  %v452_v62 = vpop.permute.xlu1 %451 }
  0xa4   : > { %v457_v2 = vadd.f32 %v450_v61, %v437_v1  ;;  %v453_v10 = vsel %vm382_vm5, %v450_v61, %v452_v62  ;;  %v459_v20 = vadd.f32 %v452_v62, %v439_v12 }
  0xa5   : > { %v458_v13 = vadd.f32 %v453_v10, %v438_v7 }
  0xa6   : > { %347 = vrot.lane.b32.xlu0 %v344_v52, %s2792_s27  ;;  %414 = vrot.lane.b32.xlu1 %v406_v53, %s2794_s16 }
  0xa7   : > { %v501_v63 = vpop.permute.xlu0 %500  ;;  %v503_v0 = vpop.permute.xlu1 %502 }
  0xa8   : > { %v505_v25 = vsel %vm504_vm7, %v501_v63, %v503_v0  ;;  %v509_v26 = vmul.f32 %v501_v63, %v2246_v23  ;;  %v511_v34 = vmul.f32 %v503_v0, %v2250_v28 }
  0xa9   : > { %v510_v32 = vmul.f32 %v505_v25, %v2256_v33  ;;  %v1810_v25 = vld [vmem:[%s2818_s3 + $0x18] sm:$0xff] }
  0xaa   : > { %380 = vrot.lane.b32.xlu0 %v372_v55, %s2800_s22  ;;  %378 = vrot.lane.b32.xlu1 %v371_v56, %s2800_s22  ;;  %s2823_s22 = smov 126  }
  0xae   : > { %410 = vrot.lane.b32.xlu0 %v404_v58, %s2794_s16 }
  0xb2   : > { %412 = vrot.lane.b32.xlu0 %v405_v60, %s2794_s16 }
 0x100   : > { %v483_v3 = vpop.permute.xlu0 %482  ;;  %v532_v4 = vpop.permute.xlu1 %531 }
 0x101   : > { %v493_v6 = vadd.f32 %v483_v3, %v457_v2 }
 0x103   : > { %581 = vrot.lane.b32.xlu1 %v493_v6, %s2806_s29 }
 0x104   : > { %v536_v8 = vpop.permute.xlu1 %535 }
 0x105   : > { %v544_v40 = vadd.f32 %v536_v8, %v511_v34 }
 0x108   : > { %v565_v14 = vpop.permute.xlu0 %564  ;;  %v485_v15 = vpop.permute.xlu1 %484 }
 0x109   : > { %v488_v16 = vsel %vm416_vm6, %v483_v3, %v485_v15 }
 0x10a   : > { %v494_v19 = vadd.f32 %v488_v16, %v458_v13  ;;  %v1818_v16 = vld [vmem:[%s2818_s3 + $0x58] sm:$0xff] }
 0x10c   : > { %v487_v21 = vpop.permute.xlu0 %486  ;;  %583 = vrot.lane.b32.xlu1 %v494_v19, %s2806_s29  ;;  %v567_v27 = vpop.permute.xlu1 %566  ;;  %v1821_v19 = vld [vmem:[%s2818_s3 + $0x70] sm:$0xff] }
 0x10d   : > { %v489_v22 = vsel %vm416_vm6, %v485_v15, %v487_v21  ;;  %v570_v36 = vsel %vm416_vm6, %v565_v14, %v567_v27  ;;  %v1817_v15 = vld [vmem:[%s2818_s3 + $0x50] sm:$0xff]  ;;  %v1823_v21 = vld [vmem:[%s2818_s3 + $0x80] sm:$0xff] }
 0x10e   : > { %v495_v24 = vadd.f32 %v489_v22, %v459_v20  ;;  %v1822_v20 = vld [vmem:[%s2818_s3 + $0x78] sm:$0xff]  ;;  %v1824_v22 = vld [vmem:[%s2818_s3 + $0x88] sm:$0xff] }
 0x110   : > { %v534_v29 = vpop.permute.xlu0 %533  ;;  %585 = vrot.lane.b32.xlu0 %v495_v24, %s2806_s29  ;;  %v346_v33 = vpop.permute.xlu1 %345  ;;  %v1809_v24 = vld [vmem:[%s2818_s3 + $0x10] sm:$0xff] }
 0x111   : > { %v537_v30 = vsel %vm382_vm5, %v532_v4, %v534_v29  ;;  %v538_v31 = vsel %vm382_vm5, %v534_v29, %v536_v8  ;;  %v354_v55 = vmul.f32 %v346_v33, %v2269_v44  ;;  %v1811_v29 = vld [vmem:[%s2818_s3 + $0x20] sm:$0xff] }
 0x112   : > { %v542_v35 = vadd.f32 %v537_v30, %v509_v26  ;;  %v543_v37 = vadd.f32 %v538_v31, %v510_v32  ;;  %v1813_v26 = vld [vmem:[%s2818_s3 + $0x30] sm:$0xff]  ;;  %v1812_v30 = vld [vmem:[%s2818_s3 + $0x28] sm:$0xff]  ;;  %v1819_v31 = vld [vmem:[%s2818_s3 + $0x60] sm:$0xff] }
 0x113   : > { %v1820_v32 = vld [vmem:[%s2818_s3 + $0x68] sm:$0xff] }
 0x114   : > { %v569_v38 = vpop.permute.xlu0 %568  ;;  %v575_v39 = vadd.f32 %v570_v36, %v542_v35  ;;  %v377_v43 = vpop.permute.xlu1 %376 }
 0x115   : > { %v571_v23 = vsel %vm416_vm6, %v567_v27, %v569_v38  ;;  %v577_v42 = vadd.f32 %v569_v38, %v544_v40  ;;  %v1814_v27 = vld [vmem:[%s2818_s3 + $0x38] sm:$0xff]  ;;  %v613_v38 = vld [vmem:[%s2822_s2] sm:$0xff]  ;;  %s323_s2 = sand.u32 1, %s2066_s10  }
 0x116   : > { %598 = vrot.lane.b32.xlu0 %v575_v39, %s2790_s28  ;;  %v576_v41 = vadd.f32 %v571_v23, %v543_v37 }
 0x118   : > { %600 = vrot.lane.b32.xlu1 %v576_v41, %s2790_s28  ;;  %v348_v28 = vpop.permute.xlu0 %347  ;;  %v415_v46 = vpop.permute.xlu1 %414 }
 0x119   : > { %v350_v48 = vsel %vm349_vm8, %v346_v33, %v348_v28  ;;  %v356_v53 = vmul.f32 %v348_v28, %v2233_v18 }
 0x11a   : > { %602 = vrot.lane.b32.xlu0 %v577_v42, %s2790_s28  ;;  %v355_v50 = vmul.f32 %v350_v48, %v2231_v17  ;;  %s2825_s28 = smov 96  }
 0x11c   : > { %v381_v45 = vpop.permute.xlu0 %380  ;;  %v379_v49 = vpop.permute.xlu1 %378 }
 0x11d   : > { %v384_v52 = vsel %vm382_vm5, %v379_v49, %v381_v45  ;;  %v383_v58 = vsel %vm382_vm5, %v377_v43, %v379_v49  ;;  %v390_v60 = vadd.f32 %v381_v45, %v356_v53 }
 0x11e   : > { %v389_v56 = vadd.f32 %v384_v52, %v355_v50  ;;  %v388_v63 = vadd.f32 %v383_v58, %v354_v55 }
 0x11f   : > { %v424_v18 = vadd.f32 %v415_v46, %v390_v60 }
 0x120   : > { %v411_v47 = vpop.permute.xlu0 %410 }
 0x124   : > { %v413_v51 = vpop.permute.xlu0 %412 }
 0x125   : > { %v418_v59 = vsel %vm416_vm6, %v413_v51, %v415_v46  ;;  %v417_v1 = vsel %vm416_vm6, %v411_v47, %v413_v51 }
 0x126   : > { %v423_v17 = vadd.f32 %v418_v59, %v389_v56  ;;  %v422_v5 = vadd.f32 %v417_v1, %v388_v63 }
 0x175   : > { %v582_v54 = vpop.permute.xlu1 %581 }
 0x17e   : > { %v584_v61 = vpop.permute.xlu1 %583 }
 0x17f   : > { %v587_v44 = vsel %vm365_vm3, %v582_v54, %v584_v61 }
 0x180   : > { %v592_v12 = vadd.f32 %v587_v44, %v422_v5 }
 0x182   : > { %v586_v57 = vpop.permute.xlu0 %585 }
 0x183   : > { %v588_v62 = vsel %vm365_vm3, %v584_v61, %v586_v57  ;;  %v594_v6 = vadd.f32 %v586_v57, %v424_v18  ;;  %v1815_v61 = vld [vmem:[%s2818_s3 + $0x40] sm:$0xff] }
 0x184   : > { %v593_v2 = vadd.f32 %v588_v62, %v423_v17  ;;  %v1816_v62 = vld [vmem:[%s2818_s3 + $0x48] sm:$0xff] }
 0x188   : > { %v599_v0 = vpop.permute.xlu0 %598 }
 0x189   : > { %v610_v14 = vadd.f32 %v599_v0, %v592_v12  ;;  %v726_v12 = vld [vmem:[%s2818_s3] sm:$0xff] }
 0x18a   : > { %v601_v3 = vpop.permute.xlu1 %600 }
 0x18b   : > { %v605_v4 = vsel %vm604_vm9, %v599_v0, %v601_v3 }
 0x18c   : > { %v611_v7 = vadd.f32 %v605_v4, %v593_v2  ;;  %v603_v8 = vpop.permute.xlu0 %602 }
 0x18d   : > { %v606_v10 = vsel %vm604_vm9, %v601_v3, %v603_v8 }
 0x18e   : > { %v612_v13 = vadd.f32 %v606_v10, %v594_v6  ;;  %619 = vrot.lane.b32.xlu1 %v611_v7, %s2808_s24 }
 0x190   : > { %621 = vrot.lane.b32.xlu0 %v612_v13, %s2808_s24 }
 0x192   : > { %617 = vrot.lane.b32.xlu1 %v610_v14, %s2808_s24 }
 0x194   : > { %849 = vrot.lane.b32.xlu0 %v1817_v15, %s2804_s26 }
 0x196   : > { %851 = vrot.lane.b32.xlu1 %v1818_v16, %s2804_s26  ;;  %s2827_s26 = smov 16  }
 0x198   : > { %898 = vrot.lane.b32.xlu0 %v1821_v19, %s2802_s25 }
 0x19a   : > { %900 = vrot.lane.b32.xlu1 %v1822_v20, %s2802_s25  ;;  %s2821_s25 = smov 15  }
 0x19c   : > { %931 = vrot.lane.b32.xlu0 %v1823_v21, %s2808_s24  ;;  %v727_v21 = vld [vmem:[%s2818_s3 + $0x8] sm:$0xff]  ;;  %s1793_s3 = sshll.u32 %s323_s2, 3 }
 0x19d   : > { %s325_s16 = scalar_lea.vmem [#allocation3], %s1793_s3 }
 0x19e   : > { %933 = vrot.lane.b32.xlu1 %v1824_v22, %s2808_s24 }
 0x1a0   : > { %746 = vrot.lane.b32.xlu0 %v1809_v24, %s2806_s29 }
 0x1a2   : > { %748 = vrot.lane.b32.xlu1 %v1810_v25, %s2806_s29 }
 0x1a4   : > { %812 = vrot.lane.b32.xlu0 %v1813_v26, %s2819_s14 }
 0x1a6   : > { %814 = vrot.lane.b32.xlu1 %v1814_v27, %s2819_s14 }
 0x1a8   : > { %779 = vrot.lane.b32.xlu0 %v1811_v29, %s2820_s17 }
 0x1aa   : > { %781 = vrot.lane.b32.xlu1 %v1812_v30, %s2820_s17 }
 0x1ac   : > { %882 = vrot.lane.b32.xlu0 %v1819_v31, %s2821_s25 }
 0x1ae   : > { %884 = vrot.lane.b32.xlu1 %v1820_v32, %s2821_s25 }
 0x200   : > { %v620_v34 = vpop.permute.xlu1 %619 }
 0x202   : > { %v622_v35 = vpop.permute.xlu0 %621 }
 0x203   : > { %v624_v36 = vsel %vm553_vm1, %v620_v34, %v622_v35 }
 0x204   : > { %v618_v37 = vpop.permute.xlu1 %617  ;;  %1804 = vmatprep.subr.msk.mxu0 %vm629_vm10, %v624_v36 }
 0x205   : > { %v623_v39 = vsel %vm553_vm1, %v618_v37, %v620_v34 }
 0x206   : > { %1805 = vmatpush1.msk.msra.mxu0 %vm629_vm10, %v623_v39  ;;  %v850_v50 = vpop.permute.xlu0 %849 }
 0x207   : > { %1806 = vmatmul.mubr.msk.f32.vlgmr.msra.gmra.mxu0 %vm625_vm11, %v613_v38 }
 0x208   : > { %v852_v23 = vpop.permute.xlu1 %851 }
 0x209   : > { %v859_v40 = vmul.f32 0.0, %v852_v23  ;;  %v853_v2 = vsel %vm471_vm0, %v850_v50, %v852_v23 }
 0x20a   : > { %v899_v58 = vpop.permute.xlu0 %898 }
 0x20b   : > { %867 = vrot.lane.b32.xlu0 %v859_v40, %s2823_s22 }
 0x20c   : > { %v901_v41 = vpop.permute.xlu1 %900 }
 0x20d   : > { %v908_v42 = vmul.f32 0.0, %v901_v41  ;;  %v902_v8 = vsel %vm520_vm2, %v899_v58, %v901_v41 }
 0x20e   : > { %v932_v0 = vpop.permute.xlu0 %931 }
 0x20f   : > { %916 = vrot.lane.b32.xlu1 %v908_v42, %s2819_s14 }
 0x210   : > { %v934_v1 = vpop.permute.xlu1 %933 }
 0x211   : > { %v935_v44 = vsel %vm553_vm1, %v932_v0, %v934_v1  ;;  %v941_v16 = vmul.f32 0.0, %v934_v1 }
 0x212   : > { %v747_v5 = vpop.permute.xlu0 %746 }
 0x213   : > { %v754_v20 = vmul.f32 0.0, %v747_v5 }
 0x214   : > { %v749_v6 = vpop.permute.xlu1 %748 }
 0x215   : > { %v750_v13 = vsel %vm365_vm3, %v747_v5, %v749_v6 }
 0x216   : > { %v813_v14 = vpop.permute.xlu0 %812 }
 0x217   : > { %v820_v39 = vmul.f32 0.0, %v813_v14 }
 0x218   : > { %v815_v15 = vpop.permute.xlu1 %814 }
 0x219   : > { %v816_v37 = vsel %vm382_vm5, %v813_v14, %v815_v15 }
 0x21a   : > { %v780_v22 = vpop.permute.xlu0 %779 }
 0x21b   : > { %v787_v29 = vmul.f32 0.0, %v780_v22 }
 0x21c   : > { %v782_v24 = vpop.permute.xlu1 %781 }
 0x21d   : > { %v783_v25 = vsel %vm399_vm4, %v780_v22, %v782_v24 }
 0x21e   : > { %v883_v32 = vpop.permute.xlu0 %882 }
 0x220   : > { %v885_v31 = vpop.permute.xlu1 %884 }
 0x27d   : > { %v868_v35 = vpop.permute.xlu0 %867 }
 0x281   : > { %v917_v34 = vpop.permute.xlu1 %916 }
 0x2c7   : > { %v700_v33 = vpop.f32.mrf.mxu0 }
 0x2c8   : > { %v707_v28 = vmin.f32 %v700_v33, 0.0  ;;  %vm705_vm12 = vcmp.gt.f32.partialorder %v700_v33, 0.0 }
 0x2c9   : > { %v702_v43 = vpop.f32.mrf.mxu0 }
 0x2ca   : > { %v709_v45 = vmul.f32 1.442695, %v707_v28  ;;  %v708_v46 = vmin.f32 %v702_v43, 0.0  ;;  %vm706_vm13 = vcmp.gt.f32.partialorder %v702_v43, 0.0 }
 0x2cc   : > { %2003 = vpow2.f32 %v709_v45  ;;  %v711_v47 = vmul.f32 1.442695, %v708_v46 }
 0x2ce   : > { %2005 = vpow2.f32 %v711_v47 }
 0x2d9   : > { %v2004_v48 = vpop.eup %2003 }
 0x2da   : > { %v1807_v49 = vadd.f32 -1.0, %v2004_v48 }
 0x2db   : > { %v2006_v51 = vpop.eup %2005 }
 0x2dc   : > { %v715_v52 = vmul.f32 1.6732632, %v1807_v49  ;;  %v1808_v53 = vadd.f32 -1.0, %v2006_v51 }
 0x2de   : > { %v717_v54 = vsel %vm705_vm12, %v700_v33, %v715_v52  ;;  %v716_v55 = vmul.f32 1.6732632, %v1808_v53  ;;  %v886_v53 = vsel %vm504_vm7, %v883_v32, %v885_v31 }
 0x2df   : > { %v2396_v56 = vmul.f32 1.050701, %v717_v54 }
 0x2e0   : > { %v718_v57 = vsel %vm706_vm13, %v702_v43, %v716_v55 }
 0x2e1   : > { %v2398_v59 = vmul.f32 1.050701, %v718_v57  ;;  %v906_v60 = vmul.f32 %v899_v58, %v2396_v56  ;;  %v826_v63 = vmul.f32 %v1815_v61, %v2396_v56  ;;  %v857_v18 = vmul.f32 %v850_v50, %v2396_v56 }
 0x2e2   : > { %v939_v4 = vmul.f32 %v932_v0, %v2396_v56  ;;  %v755_v19 = vmul.f32 %v750_v13, %v2396_v56  ;;  %v788_v26 = vmul.f32 %v783_v25, %v2396_v56  ;;  %v821_v41 = vmul.f32 %v816_v37, %v2396_v56 }
 0x2e3   : > { %912 = vrot.lane.b32.xlu1 %v906_v60, %s2819_s14  ;;  %v827_v17 = vmul.f32 %v1816_v62, %v2398_v59  ;;  %830 = vrot.lane.b32.xlu0 %v826_v63, %s2819_s14  ;;  %v858_v3 = vmul.f32 %v853_v2, %v2398_v59  ;;  %v940_v7 = vmul.f32 %v935_v44, %v2398_v59  ;;  %v892_v62 = vmul.f32 0.0, %v885_v31 }
 0x2e4   : > { %v907_v10 = vmul.f32 %v902_v8, %v2398_v59  ;;  %v789_v27 = vmul.f32 %v782_v24, %v2398_v59  ;;  %v756_v30 = vmul.f32 %v749_v6, %v2398_v59  ;;  %v822_v42 = vmul.f32 %v815_v15, %v2398_v59 }
 0x2e5   : > { %v890_v54 = vmul.f32 %v883_v32, %v2396_v56  ;;  %v891_v61 = vmul.f32 %v886_v53, %v2398_v59  ;;  %v1829_v53 = vld [vmem:[%s2785_s5 + $0x18] sm:$0xff] }
 0x2e7   : > { %832 = vrot.lane.b32.xlu1 %v827_v17, %s2819_s14  ;;  %863 = vrot.lane.b32.xlu0 %v857_v18, %s2823_s22 }
 0x2eb   : > { %865 = vrot.lane.b32.xlu1 %v858_v3, %s2823_s22  ;;  %945 = vrot.lane.b32.xlu0 %v939_v4, %s2823_s22  ;;  %v925_v3 = vadd.f32 %v917_v34, %v892_v62 }
 0x2ef   : > { %947 = vrot.lane.b32.xlu1 %v940_v7, %s2823_s22  ;;  %914 = vrot.lane.b32.xlu0 %v907_v10, %s2819_s14 }
 0x2f3   : > { %730 = vrot.lane.b32.xlu1 %v726_v12, %s2824_s23  ;;  %949 = vrot.lane.b32.xlu0 %v941_v16, %s2823_s22 }
 0x2f7   : > { %762 = vrot.lane.b32.xlu1 %v755_v19, %s2819_s14  ;;  %732 = vrot.lane.b32.xlu0 %v727_v21, %s2824_s23 }
 0x2fb   : > { %760 = vrot.lane.b32.xlu1 %v754_v20, %s2819_s14  ;;  %795 = vrot.lane.b32.xlu0 %v788_v26, %s2823_s22 }
 0x2ff   : > { %797 = vrot.lane.b32.xlu1 %v789_v27, %s2823_s22  ;;  %793 = vrot.lane.b32.xlu0 %v787_v29, %s2823_s22 }
 0x303   : > { %764 = vrot.lane.b32.xlu0 %v756_v30, %s2819_s14 }
 0x355   : > { %v913_v36 = vpop.permute.xlu1 %912  ;;  %v831_v38 = vpop.permute.xlu0 %830 }
 0x356   : > { %v838_v33 = vadd.f32 %v831_v38, %v820_v39 }
 0x359   : > { %v833_v23 = vpop.permute.xlu1 %832  ;;  %v864_v28 = vpop.permute.xlu0 %863 }
 0x35a   : > { %v834_v40 = vsel %vm382_vm5, %v831_v38, %v833_v23  ;;  %v840_v45 = vadd.f32 %v833_v23, %v822_v42  ;;  %v874_v46 = vadd.f32 %v864_v28, %v838_v33 }
 0x35b   : > { %v839_v43 = vadd.f32 %v834_v40, %v821_v41 }
 0x35c   : > { %962 = vrot.lane.b32.xlu1 %v874_v46, %s2806_s29  ;;  %v1836_v46 = vld [vmem:[%s2785_s5 + $0x50] sm:$0xff] }
 0x35d   : > { %v866_v47 = vpop.permute.xlu1 %865  ;;  %v946_v52 = vpop.permute.xlu0 %945 }
 0x35e   : > { %v869_v48 = vsel %vm416_vm6, %v864_v28, %v866_v47  ;;  %v870_v49 = vsel %vm416_vm6, %v866_v47, %v868_v35  ;;  %v1837_v47 = vld [vmem:[%s2785_s5 + $0x58] sm:$0xff] }
 0x35f   : > { %v875_v50 = vadd.f32 %v869_v48, %v839_v43  ;;  %v876_v51 = vadd.f32 %v870_v49, %v840_v45  ;;  %v1840_v48 = vld [vmem:[%s2785_s5 + $0x70] sm:$0xff]  ;;  %v1841_v49 = vld [vmem:[%s2785_s5 + $0x78] sm:$0xff] }
 0x361   : > { %966 = vrot.lane.b32.xlu0 %v876_v51, %s2806_s29  ;;  %964 = vrot.lane.b32.xlu1 %v875_v50, %s2806_s29  ;;  %v948_v55 = vpop.permute.xlu1 %947  ;;  %v915_v57 = vpop.permute.xlu0 %914  ;;  %s2826_s29 = smov 1   ;;  %v1842_v50 = vld [vmem:[%s2785_s5 + $0x80] sm:$0xff]  ;;  %v1843_v51 = vld [vmem:[%s2785_s5 + $0x88] sm:$0xff] }
 0x362   : > { %v918_v58 = vsel %vm382_vm5, %v913_v36, %v915_v57  ;;  %v919_v60 = vsel %vm382_vm5, %v915_v57, %v917_v34  ;;  %v951_v17 = vsel %vm416_vm6, %v946_v52, %v948_v55  ;;  %v1828_v52 = vld [vmem:[%s2785_s5 + $0x10] sm:$0xff]  ;;  %v1830_v57 = vld [vmem:[%s2785_s5 + $0x20] sm:$0xff] }
 0x363   : > { %v923_v63 = vadd.f32 %v918_v58, %v890_v54  ;;  %v924_v0 = vadd.f32 %v919_v60, %v891_v61  ;;  %v1832_v54 = vld [vmem:[%s2785_s5 + $0x30] sm:$0xff]  ;;  %v1831_v58 = vld [vmem:[%s2785_s5 + $0x28] sm:$0xff]  ;;  %v1838_v60 = vld [vmem:[%s2785_s5 + $0x60] sm:$0xff] }
 0x364   : > { %v1839_v61 = vld [vmem:[%s2785_s5 + $0x68] sm:$0xff] }
 0x365   : > { %v950_v1 = vpop.permute.xlu0 %949  ;;  %v956_v18 = vadd.f32 %v951_v17, %v923_v63  ;;  %v731_v5 = vpop.permute.xlu1 %730 }
 0x366   : > { %v952_v2 = vsel %vm416_vm6, %v948_v55, %v950_v1  ;;  %v958_v4 = vadd.f32 %v950_v1, %v925_v3  ;;  %v738_v26 = vmul.f32 0.0, %v731_v5  ;;  %v1833_v55 = vld [vmem:[%s2785_s5 + $0x38] sm:$0xff]  ;;  %v993_v1 = vld [vmem:[%s2784_s4] sm:$0xff] }
 0x367   : > { %v957_v44 = vadd.f32 %v952_v2, %v924_v0  ;;  %979 = vrot.lane.b32.xlu0 %v956_v18, %s2825_s28 }
 0x369   : > { %981 = vrot.lane.b32.xlu1 %v957_v44, %s2825_s28  ;;  %v733_v6 = vpop.permute.xlu0 %732  ;;  %v763_v7 = vpop.permute.xlu1 %762 }
 0x36a   : > { %v734_v16 = vsel %vm349_vm8, %v731_v5, %v733_v6  ;;  %v740_v21 = vmul.f32 %v733_v6, %v2398_v59 }
 0x36b   : > { %983 = vrot.lane.b32.xlu0 %v958_v4, %s2825_s28  ;;  %v739_v20 = vmul.f32 %v734_v16, %v2396_v56 }
 0x36d   : > { %v796_v8 = vpop.permute.xlu0 %795  ;;  %v761_v10 = vpop.permute.xlu1 %760 }
 0x36e   : > { %v766_v29 = vsel %vm382_vm5, %v761_v10, %v763_v7 }
 0x36f   : > { %v771_v36 = vadd.f32 %v766_v29, %v738_v26  ;;  %v1834_v29 = vld [vmem:[%s2785_s5 + $0x40] sm:$0xff] }
 0x371   : > { %v794_v12 = vpop.permute.xlu0 %793  ;;  %v798_v13 = vpop.permute.xlu1 %797 }
 0x372   : > { %v800_v30 = vsel %vm416_vm6, %v796_v8, %v798_v13  ;;  %v799_v35 = vsel %vm416_vm6, %v794_v12, %v796_v8 }
 0x373   : > { %v804_v23 = vadd.f32 %v799_v35, %v771_v36 }
 0x375   : > { %v765_v14 = vpop.permute.xlu0 %764 }
 0x376   : > { %v767_v19 = vsel %vm382_vm5, %v763_v7, %v765_v14  ;;  %v773_v27 = vadd.f32 %v765_v14, %v740_v21 }
 0x377   : > { %v772_v22 = vadd.f32 %v767_v19, %v739_v20 }
 0x378   : > { %v806_v37 = vadd.f32 %v798_v13, %v773_v27 }
 0x379   : > { %v805_v32 = vadd.f32 %v800_v30, %v772_v22  ;;  %v1835_v30 = vld [vmem:[%s2785_s5 + $0x48] sm:$0xff] }
 0x3ce   : > { %v963_v15 = vpop.permute.xlu1 %962 }
 0x3d3   : > { %v965_v24 = vpop.permute.xlu1 %964  ;;  %v967_v25 = vpop.permute.xlu0 %966 }
 0x3d4   : > { %v969_v31 = vsel %vm365_vm3, %v965_v24, %v967_v25  ;;  %v968_v59 = vsel %vm365_vm3, %v963_v15, %v965_v24  ;;  %v975_v40 = vadd.f32 %v967_v25, %v806_v37 }
 0x3d5   : > { %v974_v56 = vadd.f32 %v969_v31, %v805_v32  ;;  %v973_v28 = vadd.f32 %v968_v59, %v804_v23 }
 0x3d9   : > { %v980_v34 = vpop.permute.xlu0 %979 }
 0x3da   : > { %v990_v45 = vadd.f32 %v980_v34, %v973_v28 }
 0x3db   : > { %v982_v38 = vpop.permute.xlu1 %981 }
 0x3dc   : > { %v985_v39 = vsel %vm604_vm9, %v980_v34, %v982_v38 }
 0x3dd   : > { %v991_v41 = vadd.f32 %v985_v39, %v974_v56  ;;  %v984_v42 = vpop.permute.xlu0 %983 }
 0x3de   : > { %v986_v33 = vsel %vm604_vm9, %v982_v38, %v984_v42 }
 0x3df   : > { %v992_v43 = vadd.f32 %v986_v33, %v975_v40  ;;  %999 = vrot.lane.b32.xlu1 %v991_v41, %s2808_s24  ;;  %v1103_v33 = vld [vmem:[%s2785_s5] sm:$0xff] }
 0x3e1   : > { %1001 = vrot.lane.b32.xlu0 %v992_v43, %s2808_s24 }
 0x3e3   : > { %997 = vrot.lane.b32.xlu1 %v990_v45, %s2808_s24  ;;  %s2829_s24 = smov 112  }
 0x3e5   : > { %1226 = vrot.lane.b32.xlu0 %v1836_v46, %s2826_s29 }
 0x3e7   : > { %1228 = vrot.lane.b32.xlu1 %v1837_v47, %s2826_s29 }
 0x3e9   : > { %1275 = vrot.lane.b32.xlu0 %v1840_v48, %s2827_s26 }
 0x3eb   : > { %1277 = vrot.lane.b32.xlu1 %v1841_v49, %s2827_s26  ;;  %v1104_v49 = vld [vmem:[%s2785_s5 + $0x8] sm:$0xff]  ;;  %s1730_s26 = sshll.u32 %s325_s16, 4  ;;  %s1731_s26 = int_to_ptr.vmem [resolvable:$true] %s1730_s26 }
 0x3ed   : > { %1308 = vrot.lane.b32.xlu0 %v1842_v50, %s2828_s0 }
 0x3ef   : > { %1310 = vrot.lane.b32.xlu1 %v1843_v51, %s2828_s0 }
 0x3f1   : > { %1123 = vrot.lane.b32.xlu0 %v1828_v52, %s2829_s24 }
 0x3f3   : > { %1125 = vrot.lane.b32.xlu1 %v1829_v53, %s2829_s24 }
 0x3f5   : > { %1189 = vrot.lane.b32.xlu0 %v1832_v54, %s2819_s14 }
 0x3f7   : > { %1191 = vrot.lane.b32.xlu1 %v1833_v55, %s2819_s14  ;;  %v2591_v55 = vld [vmem:[#allocation2] sm:$0xff] }
 0x3f9   : > { %1156 = vrot.lane.b32.xlu0 %v1830_v57, %s2820_s17 }
 0x3fb   : > { %1158 = vrot.lane.b32.xlu1 %v1831_v58, %s2820_s17 }
 0x3fd   : > { %1259 = vrot.lane.b32.xlu0 %v1838_v60, %s2821_s25 }
 0x3ff   : > { %1261 = vrot.lane.b32.xlu1 %v1839_v61, %s2821_s25 }
 0x451   : > { %v1000_v62 = vpop.permute.xlu1 %999 }
 0x453   : > { %v1002_v63 = vpop.permute.xlu0 %1001 }
 0x454   : > { %v1004_v17 = vsel %vm553_vm1, %v1000_v62, %v1002_v63 }
 0x455   : > { %v998_v0 = vpop.permute.xlu1 %997  ;;  %1041 = vmatprep.subr.mxu1 %v1004_v17 }
 0x456   : > { %v1003_v18 = vsel %vm553_vm1, %v998_v0, %v1000_v62 }
 0x457   : > { %1042 = vmatpush1.msra.mxu1 %v1003_v18  ;;  %v1227_v15 = vpop.permute.xlu0 %1226 }
 0x458   : > { %1825 = vmatmul.mubr.msk.f32.vlgmr.msra.gmra.mxu1 %vm1007_vm14, %v993_v1 }
 0x459   : > { %1549 = vmatprep.mubr.f32.mxu1 %v2218_v11  ;;  %v1229_v2 = vpop.permute.xlu1 %1228 }
 0x45a   : > { %v1236_v3 = vmul.f32 0.0, %v1229_v2  ;;  %v1230_v37 = vsel %vm471_vm0, %v1227_v15, %v1229_v2  ;;  %vm2087_vm0 = vmmov 0  }
 0x45b   : > { %v1276_v25 = vpop.permute.xlu0 %1275 }
 0x45c   : > { %1244 = vrot.lane.b32.xlu0 %v1236_v3, %s2823_s22 }
 0x45d   : > { %v1278_v44 = vpop.permute.xlu1 %1277 }
 0x45e   : > { %v1285_v4 = vmul.f32 0.0, %v1278_v44  ;;  %v1279_v41 = vsel %vm520_vm2, %v1276_v25, %v1278_v44  ;;  %vm1714_vm2 = vcmask 523264  }
 0x45f   : > { %v1309_v34 = vpop.permute.xlu0 %1308 }
 0x460   : > { %1293 = vrot.lane.b32.xlu1 %v1285_v4, %s2819_s14 }
 0x461   : > { %v1311_v35 = vpop.permute.xlu1 %1310 }
 0x462   : > { %v1312_v38 = vsel %vm553_vm1, %v1309_v34, %v1311_v35  ;;  %v1318_v46 = vmul.f32 0.0, %v1311_v35  ;;  %v1400_v35 = vld [vmem:[%s2788_s8 + $0xf0] sm:$0xff] }
 0x463   : > { %v1124_v39 = vpop.permute.xlu0 %1123 }
 0x464   : > { %v1131_v48 = vmul.f32 0.0, %v1124_v39 }
 0x465   : > { %v1126_v23 = vpop.permute.xlu1 %1125 }
 0x466   : > { %v1127_v28 = vsel %vm365_vm3, %v1124_v39, %v1126_v23  ;;  %v1399_v39 = vld [vmem:[%s2788_s8 + $0xe8] sm:$0xff] }
 0x467   : > { %v1190_v43 = vpop.permute.xlu0 %1189 }
 0x468   : > { %v1197_v18 = vmul.f32 %v2591_v55, %v1190_v43 }
 0x469   : > { %v1192_v45 = vpop.permute.xlu1 %1191 }
 0x46a   : > { %v1193_v0 = vsel %vm382_vm5, %v1190_v43, %v1192_v45  ;;  %v1382_v43 = vld [vmem:[%s2788_s8 + $0x60] sm:$0xff] }
 0x46b   : > { %v1157_v50 = vpop.permute.xlu0 %1156 }
 0x46c   : > { %v1164_v57 = vmul.f32 %v2591_v55, %v1157_v50 }
 0x46d   : > { %v1159_v51 = vpop.permute.xlu1 %1158 }
 0x46e   : > { %v1160_v52 = vsel %vm399_vm4, %v1157_v50, %v1159_v51  ;;  %v1379_v50 = vld [vmem:[%s2788_s8 + $0x48] sm:$0xff] }
 0x46f   : > { %v1260_v62 = vpop.permute.xlu0 %1259 }
 0x471   : > { %v1262_v60 = vpop.permute.xlu1 %1261 }
 0x4ce   : > { %v1245_v63 = vpop.permute.xlu0 %1244 }
 0x4d2   : > { %v1294_v61 = vpop.permute.xlu1 %1293 }
 0x518   : > { %v1077_v5 = vpop.f32.mrf.mxu1 }
 0x519   : > { %v1084_v6 = vmin.f32 %v1077_v5, 0.0  ;;  %vm1082_vm15 = vcmp.gt.f32.partialorder %v1077_v5, 0.0 }
 0x51a   : > { %v1079_v7 = vpop.f32.mrf.mxu1 }
 0x51b   : > { %v1086_v8 = vmul.f32 1.442695, %v1084_v6  ;;  %v1085_v10 = vmin.f32 %v1079_v7, 0.0  ;;  %vm1083_vm12 = vcmp.gt.f32.partialorder %v1079_v7, 0.0 }
 0x51d   : > { %2007 = vpow2.f32 %v1086_v8  ;;  %v1088_v12 = vmul.f32 1.442695, %v1085_v10 }
 0x51f   : > { %2009 = vpow2.f32 %v1088_v12 }
 0x52a   : > { %v2008_v13 = vpop.eup %2007 }
 0x52b   : > { %v1826_v14 = vadd.f32 -1.0, %v2008_v13 }
 0x52c   : > { %v2010_v11 = vpop.eup %2009 }
 0x52d   : > { %v1092_v16 = vmul.f32 1.6732632, %v1826_v14  ;;  %v1827_v19 = vadd.f32 -1.0, %v2010_v11 }
 0x52f   : > { %v1094_v20 = vsel %vm1082_vm15, %v1077_v5, %v1092_v16  ;;  %v1093_v21 = vmul.f32 1.6732632, %v1827_v19  ;;  %v1263_v19 = vsel %vm504_vm7, %v1260_v62, %v1262_v60 }
 0x530   : > { %v2544_v22 = vmul.f32 1.050701, %v1094_v20 }
 0x531   : > { %v1095_v24 = vsel %vm1083_vm12, %v1079_v7, %v1093_v21 }
 0x532   : > { %1098 = vst [vmem:[#allocation2 + $0x10] sm:$0xff] %v2544_v22  ;;  %v2547_v26 = vmul.f32 1.050701, %v1095_v24  ;;  %v1283_v27 = vmul.f32 %v1276_v25, %v2544_v22  ;;  %v1203_v31 = vmul.f32 %v1834_v29, %v2544_v22  ;;  %v1234_v36 = vmul.f32 %v1227_v15, %v2544_v22 }
 0x533   : > { %v1316_v59 = vmul.f32 %v1309_v34, %v2544_v22  ;;  %v1132_v47 = vmul.f32 %v1127_v28, %v2544_v22  ;;  %v1165_v53 = vmul.f32 %v1160_v52, %v2544_v22  ;;  %v1198_v44 = vmul.f32 %v1193_v0, %v2544_v22  ;;  %v1385_v34 = vld [vmem:[%s2788_s8 + $0x78] sm:$0xff]  ;;  %v1378_v52 = vld [vmem:[%s2788_s8 + $0x40] sm:$0xff] }
 0x534   : > { %1099 = vst [vmem:[#allocation2 + $0x18] sm:$0xff] %v2547_v26  ;;  %1289 = vrot.lane.b32.xlu1 %v1283_v27, %s2819_s14  ;;  %v1204_v32 = vmul.f32 %v1835_v30, %v2547_v26  ;;  %1207 = vrot.lane.b32.xlu0 %v1203_v31, %s2819_s14  ;;  %v1235_v56 = vmul.f32 %v1230_v37, %v2547_v26  ;;  %v1384_v37 = vld [vmem:[%s2788_s8 + $0x70] sm:$0xff] }
 0x535   : > { %v1317_v40 = vmul.f32 %v1312_v38, %v2547_v26  ;;  %v1284_v42 = vmul.f32 %v1279_v41, %v2547_v26  ;;  %v1166_v54 = vmul.f32 %v1159_v51, %v2547_v26  ;;  %v1133_v58 = vmul.f32 %v1126_v23, %v2547_v26  ;;  %v1394_v51 = vld [vmem:[%s2788_s8 + $0xc0] sm:$0xff] }
 0x536   : > { %v1199_v4 = vmul.f32 %v1192_v45, %v2547_v26  ;;  %v1267_v20 = vmul.f32 %v1260_v62, %v2544_v22  ;;  %v1268_v29 = vmul.f32 %v1263_v19, %v2547_v26  ;;  %v1269_v30 = vmul.f32 %v2591_v55, %v1262_v60  ;;  %v1397_v45 = vld [vmem:[%s2788_s8 + $0xd8] sm:$0xff]  ;;  %v1391_v60 = vld [vmem:[%s2788_s8 + $0xa8] sm:$0xff]  ;;  %v1390_v62 = vld [vmem:[%s2788_s8 + $0xa0] sm:$0xff] }
 0x538   : > { %1209 = vrot.lane.b32.xlu1 %v1204_v32, %s2819_s14  ;;  %1240 = vrot.lane.b32.xlu0 %v1234_v36, %s2823_s22  ;;  %v1401_v32 = vld [vmem:[%s2788_s8 + $0xf8] sm:$0xff]  ;;  %v1302_v41 = vadd.f32 %v1294_v61, %v1269_v30  ;;  %v1386_v30 = vld [vmem:[%s2788_s8 + $0x80] sm:$0xff] }
 0x539   : > { %1888 = vmatprep.subr.mxu1 %v1401_v32  ;;  %1853 = vmatprep.subr.mxu0 %v1401_v32  ;;  %v1370_v32 = vld [vmem:[%s2788_s8] sm:$0xff] }
 0x53a   : > { %1889 = vmatpush3.msra.mxu1 %v1385_v34  ;;  %1854 = vmatpush3.msra.mxu0 %v1385_v34 }
 0x53b   : > { %1890 = vmatprep.subr.mxu1 %v1400_v35  ;;  %1855 = vmatprep.subr.mxu0 %v1400_v35 }
 0x53c   : > { %1242 = vrot.lane.b32.xlu1 %v1235_v56, %s2823_s22  ;;  %1322 = vrot.lane.b32.xlu0 %v1316_v59, %s2823_s22 }
 0x53d   : > { %1891 = vmatpush3.msra.mxu1 %v1384_v37  ;;  %1856 = vmatpush3.msra.mxu0 %v1384_v37 }
 0x53e   : > { %1892 = vmatprep.subr.mxu1 %v1399_v39  ;;  %1857 = vmatprep.subr.mxu0 %v1399_v39 }
 0x540   : > { %1324 = vrot.lane.b32.xlu1 %v1317_v40, %s2823_s22  ;;  %1291 = vrot.lane.b32.xlu0 %v1284_v42, %s2819_s14  ;;  %v1383_v40 = vld [vmem:[%s2788_s8 + $0x68] sm:$0xff] }
 0x541   : > { %1893 = vmatpush3.msra.mxu1 %v1383_v40  ;;  %1858 = vmatpush3.msra.mxu0 %v1383_v40 }
 0x544   : > { %1107 = vrot.lane.b32.xlu1 %v1103_v33, %s2824_s23  ;;  %1326 = vrot.lane.b32.xlu0 %v1318_v46, %s2823_s22  ;;  %v1398_v33 = vld [vmem:[%s2788_s8 + $0xe0] sm:$0xff]  ;;  %v1381_v46 = vld [vmem:[%s2788_s8 + $0x58] sm:$0xff] }
 0x545   : > { %1894 = vmatprep.subr.mxu1 %v1398_v33  ;;  %1859 = vmatprep.subr.mxu0 %v1398_v33 }
 0x546   : > { %1895 = vmatpush3.msra.mxu1 %v1382_v43  ;;  %1860 = vmatpush3.msra.mxu0 %v1382_v43 }
 0x547   : > { %1896 = vmatprep.subr.mxu1 %v1397_v45  ;;  %1861 = vmatprep.subr.mxu0 %v1397_v45 }
 0x548   : > { %1139 = vrot.lane.b32.xlu1 %v1132_v47, %s2819_s14  ;;  %1109 = vrot.lane.b32.xlu0 %v1104_v49, %s2824_s23  ;;  %v1396_v47 = vld [vmem:[%s2788_s8 + $0xd0] sm:$0xff]  ;;  %v1395_v49 = vld [vmem:[%s2788_s8 + $0xc8] sm:$0xff]  ;;  %s2014_s23 = scalar_lea.vmem %s1731_s26, 128 }
 0x549   : > { %1897 = vmatpush3.msra.mxu1 %v1381_v46  ;;  %1862 = vmatpush3.msra.mxu0 %v1381_v46  ;;  %p2015_p11 = scmp.ne.s32.totalorder %s1731_s26, %s2014_s23 }
 0x54a   : > { %1898 = vmatprep.subr.mxu1 %v1396_v47  ;;  %1863 = vmatprep.subr.mxu0 %v1396_v47 }
 0x54b   : > { %p2016_p12 = pnand %p2015_p11, %p2177_p5 }
 0x54c   : > { %1137 = vrot.lane.b32.xlu1 %v1131_v48, %s2819_s14  ;;  %1172 = vrot.lane.b32.xlu0 %v1165_v53, %s2823_s22  ;;  %v1380_v48 = vld [vmem:[%s2788_s8 + $0x50] sm:$0xff]  ;;  %v1393_v53 = vld [vmem:[%s2788_s8 + $0xb8] sm:$0xff] }
 0x54d   : > { %1899 = vmatpush3.msra.mxu1 %v1380_v48  ;;  %1864 = vmatpush3.msra.mxu0 %v1380_v48  ;;  %p2017_p13 = pneg %p2016_p12 }
 0x54e   : > { %1900 = vmatprep.subr.mxu1 %v1395_v49  ;;  %1865 = vmatprep.subr.mxu0 %v1395_v49 }
 0x54f   : > { %1901 = vmatpush3.msra.mxu1 %v1379_v50  ;;  %1866 = vmatpush3.msra.mxu0 %v1379_v50 }
 0x550   : > { %1174 = vrot.lane.b32.xlu1 %v1166_v54, %s2823_s22  ;;  %1170 = vrot.lane.b32.xlu0 %v1164_v57, %s2823_s22  ;;  %v1377_v54 = vld [vmem:[%s2788_s8 + $0x38] sm:$0xff]  ;;  %v1392_v57 = vld [vmem:[%s2788_s8 + $0xb0] sm:$0xff]  ;;  %s1717_s22 = scalar_lea.sflag [#allocation4], %s323_s2 }
 0x551   : > { %1902 = vmatprep.subr.mxu1 %v1394_v51  ;;  %1867 = vmatprep.subr.mxu0 %v1394_v51 }
 0x552   : > { %1903 = vmatpush3.msra.mxu1 %v1378_v52  ;;  %1868 = vmatpush3.msra.mxu0 %v1378_v52 }
 0x553   : > { %1904 = vmatprep.subr.mxu1 %v1393_v53  ;;  %1869 = vmatprep.subr.mxu0 %v1393_v53 }
 0x554   : > { %1141 = vrot.lane.b32.xlu0 %v1133_v58, %s2819_s14  ;;  %v1376_v58 = vld [vmem:[%s2788_s8 + $0x30] sm:$0xff]  ;;  %1905 = vmatpush3.msra.mxu1 %v1377_v54 }
 0x555   : > { %1906 = vmatprep.subr.mxu1 %v1392_v57  ;;  %1870 = vmatpush3.msra.mxu0 %v1377_v54  ;;  %v1556_v54 = vld [vmem:[%s2787_s7] sm:$0xff] }
 0x556   : > { %1907 = vmatpush3.msra.mxu1 %v1376_v58  ;;  %1871 = vmatprep.subr.mxu0 %v1392_v57 }
 0x557   : > { %1908 = vmatprep.subr.mxu1 %v1391_v60  ;;  %1872 = vmatpush3.msra.mxu0 %v1376_v58 }
 0x558   : > { %1873 = vmatprep.subr.mxu0 %v1391_v60 }
 0x5a6   : > { %v1290_v17 = vpop.permute.xlu1 %1289  ;;  %v1208_v1 = vpop.permute.xlu0 %1207 }
 0x5a7   : > { %v1215_v5 = vadd.f32 %v1208_v1, %v1197_v18 }
 0x5aa   : > { %v1210_v2 = vpop.permute.xlu1 %1209  ;;  %v1241_v6 = vpop.permute.xlu0 %1240 }
 0x5ab   : > { %v1211_v3 = vsel %vm382_vm5, %v1208_v1, %v1210_v2  ;;  %v1217_v8 = vadd.f32 %v1210_v2, %v1199_v4  ;;  %v1251_v10 = vadd.f32 %v1241_v6, %v1215_v5  ;;  %v1374_v4 = vld [vmem:[%s2788_s8 + $0x20] sm:$0xff]  ;;  %v1389_v5 = vld [vmem:[%s2788_s8 + $0x98] sm:$0xff] }
 0x5ac   : > { %v1216_v7 = vadd.f32 %v1211_v3, %v1198_v44 }
 0x5ad   : > { %1339 = vrot.lane.b32.xlu1 %v1251_v10, %s2829_s24  ;;  %v1372_v10 = vld [vmem:[%s2788_s8 + $0x10] sm:$0xff] }
 0x5ae   : > { %v1243_v12 = vpop.permute.xlu1 %1242  ;;  %v1323_v16 = vpop.permute.xlu0 %1322 }
 0x5af   : > { %v1246_v13 = vsel %vm416_vm6, %v1241_v6, %v1243_v12  ;;  %v1247_v14 = vsel %vm416_vm6, %v1243_v12, %v1245_v63  ;;  %v1373_v6 = vld [vmem:[%s2788_s8 + $0x18] sm:$0xff] }
 0x5b0   : > { %v1252_v15 = vadd.f32 %v1246_v13, %v1216_v7  ;;  %v1253_v11 = vadd.f32 %v1247_v14, %v1217_v8  ;;  %v1388_v7 = vld [vmem:[%s2788_s8 + $0x90] sm:$0xff]  ;;  %v1387_v14 = vld [vmem:[%s2788_s8 + $0x88] sm:$0xff] }
 0x5b2   : > { %1343 = vrot.lane.b32.xlu0 %v1253_v11, %s2829_s24  ;;  %1341 = vrot.lane.b32.xlu1 %v1252_v15, %s2829_s24  ;;  %v1325_v21 = vpop.permute.xlu1 %1324  ;;  %v1292_v24 = vpop.permute.xlu0 %1291 }
 0x5b3   : > { %v1295_v25 = vsel %vm382_vm5, %v1290_v17, %v1292_v24  ;;  %v1296_v27 = vsel %vm382_vm5, %v1292_v24, %v1294_v61  ;;  %v1328_v36 = vsel %vm416_vm6, %v1323_v16, %v1325_v21  ;;  %v1375_v61 = vld [vmem:[%s2788_s8 + $0x28] sm:$0xff] }
 0x5b4   : > { %v1300_v31 = vadd.f32 %v1295_v25, %v1267_v20  ;;  %v1301_v56 = vadd.f32 %v1296_v27, %v1268_v29  ;;  %1909 = vmatpush3.msra.mxu1 %v1375_v61  ;;  %1874 = vmatpush3.msra.mxu0 %v1375_v61  ;;  %v1371_v16 = vld [vmem:[%s2788_s8 + $0x8] sm:$0xff]  ;;  %v1555_v61 = vld [vmem:[%s2786_s6] sm:$0xff] }
 0x5b5   : > { %1910 = vmatprep.subr.mxu1 %v1390_v62  ;;  %1875 = vmatprep.subr.mxu0 %v1390_v62 }
 0x5b6   : > { %v1333_v38 = vadd.f32 %v1328_v36, %v1300_v31  ;;  %v1327_v59 = vpop.permute.xlu0 %1326  ;;  %v1108_v63 = vpop.permute.xlu1 %1107  ;;  %1911 = vmatpush3.msra.mxu1 %v1374_v4  ;;  %1876 = vmatpush3.msra.mxu0 %v1374_v4 }
 0x5b7   : > { %v1329_v23 = vsel %vm416_vm6, %v1325_v21, %v1327_v59  ;;  %v1335_v28 = vadd.f32 %v1327_v59, %v1302_v41  ;;  %v1115_v8 = vmul.f32 %v2591_v55, %v1108_v63  ;;  %1912 = vmatprep.subr.mxu1 %v1389_v5  ;;  %1877 = vmatprep.subr.mxu0 %v1389_v5 }
 0x5b8   : > { %v1334_v42 = vadd.f32 %v1329_v23, %v1301_v56  ;;  %1356 = vrot.lane.b32.xlu0 %v1333_v38, %s2825_s28  ;;  %1913 = vmatpush3.msra.mxu1 %v1373_v6 }
 0x5b9   : > { %1878 = vmatpush3.msra.mxu0 %v1373_v6  ;;  %1914 = vmatprep.subr.mxu1 %v1388_v7 }
 0x5ba   : > { %1358 = vrot.lane.b32.xlu1 %v1334_v42, %s2825_s28  ;;  %v1140_v17 = vpop.permute.xlu1 %1139  ;;  %v1110_v0 = vpop.permute.xlu0 %1109  ;;  %1879 = vmatprep.subr.mxu0 %v1388_v7 }
 0x5bb   : > { %v1111_v15 = vsel %vm349_vm8, %v1108_v63, %v1110_v0  ;;  %1915 = vmatpush3.msra.mxu1 %v1372_v10  ;;  %1880 = vmatpush3.msra.mxu0 %v1372_v10  ;;  %v1117_v25 = vmul.f32 %v1110_v0, %v2547_v26 }
 0x5bc   : > { %1360 = vrot.lane.b32.xlu0 %v1335_v28, %s2825_s28  ;;  %1916 = vmatprep.subr.mxu1 %v1387_v14  ;;  %v1116_v24 = vmul.f32 %v1111_v15, %v2544_v22  ;;  %s1849_s28 = sshll.u32 %s2160_s13, 7  ;;  %s2018_s13 = sshll.u32 %s2088_s1, 4  ;;  %s2019_s13 = int_to_ptr.vmem [resolvable:$false] %s2018_s13 }
 0x5bd   : > { %1881 = vmatprep.subr.mxu0 %v1387_v14  ;;  %1917 = vmatpush3.msra.mxu1 %v1371_v16  ;;  %s1728_s14 = scalar_lea.hbm %s2789_s9, %s1849_s28  ;;  %s2020_s24 = scalar_lea.vmem %s2019_s13, 256 }
 0x5be   : > { %v1138_v1 = vpop.permute.xlu1 %1137  ;;  %v1173_v18 = vpop.permute.xlu0 %1172  ;;  %1882 = vmatpush3.msra.mxu0 %v1371_v16  ;;  %1918 = vmatprep.subr.mxu1 %v1386_v30  ;;  %p2021_p0 = scmp.lt.s32.totalorder %s1731_s26, %s2019_s13  ;;  %p2022_p1 = scmp.lt.s32.totalorder %s2020_s24, %s2014_s23 }
 0x5bf   : > { %v1143_v12 = vsel %vm382_vm5, %v1138_v1, %v1140_v17  ;;  %1883 = vmatprep.subr.mxu0 %v1386_v30  ;;  %1919 = vmatpush3.msra.mxu1 %v1370_v32 }
 0x5c0   : > { %v1148_v20 = vadd.f32 %v1143_v12, %v1115_v8  ;;  %1884 = vmatpush3.msra.mxu0 %v1370_v32  ;;  %1550 = vmatmul.mubr.f32.vlgmr.msra.gmra.mxu1 %v2210_v9  ;;  %p2023_p2 = por %p2022_p1, %p2021_p0 }
 0x5c1   : > { %1927 = vmatprep.subr.mxu0 %v2591_v55  ;;  %1932 = vmatprep.subr.mxu1 %v2591_v55 }
 0x5c2   : > { %v1175_v2 = vpop.permute.xlu1 %1174  ;;  %v1171_v3 = vpop.permute.xlu0 %1170  ;;  %1934 = vmatprep.mubr.msk.f32.mxu1 %vm2087_vm0, %v2591_v55  ;;  %p2024_p3 = pnand %p2023_p2, %p2017_p13 }
 0x5c3   : > { %v1176_v19 = vsel %vm416_vm6, %v1171_v3, %v1173_v18  ;;  %v1177_v36 = vsel %vm416_vm6, %v1173_v18, %v1175_v2 }
 0x5c4   : > { %v1181_v31 = vadd.f32 %v1176_v19, %v1148_v20 }
 0x5c6   : > { %v1142_v13 = vpop.permute.xlu0 %1141 }
 0x5c7   : > { %v1144_v21 = vsel %vm382_vm5, %v1140_v17, %v1142_v13  ;;  %v1150_v22 = vadd.f32 %v1142_v13, %v1117_v25 }
 0x5c8   : > { %v1149_v34 = vadd.f32 %v1144_v21, %v1116_v24 }
 0x5c9   : > { %v1183_v59 = vadd.f32 %v1175_v2, %v1150_v22 }
 0x5ca   : > { %v1182_v38 = vadd.f32 %v1177_v36, %v1149_v34 }
 0x61f   : > { %v1340_v44 = vpop.permute.xlu1 %1339 }
 0x624   : > { %v1342_v11 = vpop.permute.xlu1 %1341  ;;  %v1344_v29 = vpop.permute.xlu0 %1343 }
 0x625   : > { %v1345_v27 = vsel %vm365_vm3, %v1340_v44, %v1342_v11  ;;  %v1346_v37 = vsel %vm365_vm3, %v1342_v11, %v1344_v29  ;;  %v1352_v41 = vadd.f32 %v1344_v29, %v1183_v59 }
 0x626   : > { %v1350_v26 = vadd.f32 %v1345_v27, %v1181_v31  ;;  %v1351_v40 = vadd.f32 %v1346_v37, %v1182_v38 }
 0x62a   : > { %v1357_v35 = vpop.permute.xlu0 %1356 }
 0x62b   : > { %v1367_v56 = vadd.f32 %v1357_v35, %v1350_v26 }
 0x62c   : > { %v1359_v39 = vpop.permute.xlu1 %1358 }
 0x62d   : > { %v1362_v23 = vsel %vm604_vm9, %v1357_v35, %v1359_v39  ;;  %1405 = vrot.lane.b32.xlu0 %v1367_v56, %s2828_s0 }
 0x62e   : > { %v1361_v9 = vpop.permute.xlu0 %1360  ;;  %v1368_v33 = vadd.f32 %v1362_v23, %v1351_v40 }
 0x62f   : > { %v1363_v42 = vsel %vm604_vm9, %v1359_v39, %v1361_v9 }
 0x630   : > { %v1369_v28 = vadd.f32 %v1363_v42, %v1352_v41 }
 0x632   : > { %v1988_v43 = vpack.i.bf16 %v1369_v28, %v1368_v33 }
 0x634   : > { %1989 = vrot.lane.b32.xlu1 %v1988_v43, %s2828_s0 }
 0x680   : > { %v1920_v51 = vpop.f32.mrf.mxu1 }
 0x682   : > { %v1921_v52 = vpop.f32.mrf.mxu1 }
 0x683   : > { %v1922_v53 = vadd.f32 %v1921_v52, %v1920_v51 }
 0x69f   : > { %v1406_v48 = vpop.permute.xlu0 %1405 }
 0x6a6   : > { %v1990_v45 = vpop.permute.xlu1 %1989 }
 0x6a7   : > { %v1992_v46 = vunpack.i.h.bf16 %v1990_v45  ;;  %v1991_v47 = vunpack.i.l.bf16 %v1990_v45 }
 0x6a9   : > { %v1412_v49 = vsel %vm553_vm1, %v1991_v47, %v1992_v46  ;;  %v1411_v50 = vsel %vm553_vm1, %v1406_v48, %v1991_v47 }
 0x6aa   : > { %1479 = vmatprep.mubr.f32.mxu0 %v1412_v49 }
 0x6ab   : > { %1480 = vmatmul.mubr.f32.vlgmr.msra.gmra.mxu0 %v1411_v50 }
 0x6ac   : > { %1928 = vmatpush3.msk.msra.mxu0 %vm629_vm10, %v1922_v53  ;;  %1929 = vmatprep.mubr.msk.f32.mxu0 %vm2087_vm0, %v2591_v55 }
 0x6af   : > { %1930 = vmatmul.mubr.msk.f32.vlgmr.msra.gmra.mxu0 %vm625_vm11, %v1556_v54 }
 0x76b   : > { %v1885_v57 = vpop.f32.mrf.mxu0 }
 0x76d   : > { %v1886_v58 = vpop.f32.mrf.mxu0 }
 0x76e   : > { %v1887_v60 = vadd.f32 %v1886_v58, %v1885_v57 }
 0x76f   : > { %v1629_v62 = vpop.f32.mrf.mxu0 }
 0x770   : > { %1933 = vmatpush3.msra.mxu1 %v1887_v60 }
 0x771   : > { %1935 = vmatmul.mubr.msk.f32.vlgmr.msra.gmra.mxu1 %vm1007_vm14, %v1555_v61  ;;  %v1931_v63 = vpop.f32.mrf.mxu0 }
 0x831   : > { %v1702_v17 = vpop.f32.mrf.mxu1 }
 0x832   : > { %v1703_v0 = vadd.f32 %v1702_v17, %v1629_v62 }
 0x833   : > { %v1936_v1 = vpop.f32.mrf.mxu1 }
 0x834   : > { %v1707_v55 = vmin.f32 %v1703_v0, 0.0  ;;  %vm1706_vm1 = vcmp.gt.f32.partialorder %v1703_v0, 0.0 }
 0x836   : > { %v1708_v18 = vmul.f32 1.442695, %v1707_v55 }
 0x838   : > { %2011 = vpow2.f32 %v1708_v18 }
 0x845   : > { %v2012_v2 = vpop.eup %2011 }
 0x846   : > { %v1847_v3 = vadd.f32 -1.0, %v2012_v2 }
 0x848   : > { %v1711_v44 = vmul.f32 1.6732632, %v1847_v3 }
 0x84a   : > { %v1712_v4 = vsel %vm1706_vm1, %v1703_v0, %v1711_v44 }
 0x84b   : > { %v1713_v5 = vmul.f32 1.050701, %v1712_v4 }
 0x84d   : > { %1715 = vst.msk [vmem:[%s325_s16] sm:$0xff] %vm1714_vm2, %v1713_v5 }
 0x84e   : > { %2027 = shalt.err (!%p2024_p3)
}
 0x84f   : > { %s2028_s29 = scalar_lea.hbm %s1728_s14, 128  ;;  %s2032_s25 = scalar_lea.hbm %s2789_s9, 256 }
 0x850   : > { %p2029_p4 = scmp.ne.s32.totalorder %s1728_s14, %s2028_s29  ;;  %p2033_p9 = scmp.lt.s32.totalorder %s1728_s14, %s2789_s9 }
 0x851   : > { %p2034_p10 = scmp.lt.s32.totalorder %s2032_s25, %s2028_s29 }
 0x852   : > { %p2030_p7 = pnand %p2029_p4, %p2177_p5 }
 0x853   : > { %p2035_p11 = por %p2034_p10, %p2033_p9 }
 0x854   : > { %p2031_p8 = pneg %p2030_p7 }
 0x856   : > { %p2036_p12 = pnand %p2035_p11, %p2031_p8 }
 0x858   : > { %2039 = shalt.err (!%p2036_p12)
}
 0x859   : > { %1937 = dma.vmem_to_hbm [thread:$0]  (%p2177_p5), %s1731_s26, 128, %s1728_s14, %s1717_s22  }
 0x85a PF: > { %p1943_p13 = scmp.ge.s32.totalorder %s2074_s12, 2  ;;  %s1742_s28 = sand.u32 1, %s2062_s30  }
 0x85b   : > { %s1743_s16 = scalar_lea.sflag [#allocation4], %s1742_s28 }
 0x85c   : > { %p1940_p0 = pnand %p1943_p13, %p2181_p6 }
 0x85e   : > { %p1941_p1 = pneg %p1940_p0 }
 0x860   : > { %2057 = dma.done.wait (%p1941_p1), %s1743_s16, 128  }
 0x861   : > { %2059 = vsyncadd (%p1941_p1), %s1743_s16, 4294967168  ;;  %p19_p2 = scmp.ge.s32.totalorder %s2164_s15, 4   ;;  %s2830_s30 = smov %s2066_s10 }
 0x862   : > { %s2831_s10 = smov %s2070_s11  ;;  %s2832_s11 = smov %s2175_s18 }
 0x863   : > { %s2833_s12 = smov %s2164_s15  ;;  %21 = sbr.rel (!%p19_p2) target bundleno = 8 (0x8), region = 115 }
 0x868   :  { %1748 = vsyncpa [#allocation4], 1 }
 0x869   :  { %1750 = vsyncpa [#allocation4 + $0x1], 1 }

</bundles_post_ra>
